<compile_context>
chip_gen: v5e
topology: v5e:2x2
jax: 0.10.0
libtpu: 0.0.40
codegen_flags: <defaults>
</compile_context>

<pallas_src>
import functools
import math

import jax
import jax.numpy as jnp
from jax.experimental import pallas as pl
from jax.experimental.pallas import tpu as pltpu

EPS = 1e-6

# Row order of the packed small-parameter slab (wrapper must match the kernel).
_ROW_LN1_A, _ROW_LN1_B, _ROW_LN2_A, _ROW_LN2_B = 0, 1, 2, 3
_ROW_BO, _ROW_B2, _ROW_BQKV, _ROW_B1 = 4, 5, 6, 7
_NUM_PARAM_ROWS = 8


def encoder_layer_kernel(x_ref, mask_ref, p_ref, wqkv_ref, wo_ref, w1_ref, w2_ref,
                         o_ref, *, num_heads, batch, seq):
    f32 = jnp.float32
    xb = x_ref[...].astype(f32)                       # (M, D) residual stream, M = B*S
    M, D = xb.shape
    H = num_heads
    dk = D // H
    F = w1_ref.shape[-1]
    scale = 1.0 / math.sqrt(dk)
    mdt = wqkv_ref.dtype                              # MXU operand dtype (bf16)

    # ---- packed small parameters: one VMEM window, static row slices (zero-cost views) ----
    ln1_a = p_ref[_ROW_LN1_A:_ROW_LN1_A + 1, 0:D]
    ln1_b = p_ref[_ROW_LN1_B:_ROW_LN1_B + 1, 0:D]
    ln2_a = p_ref[_ROW_LN2_A:_ROW_LN2_A + 1, 0:D]
    ln2_b = p_ref[_ROW_LN2_B:_ROW_LN2_B + 1, 0:D]
    b_o   = p_ref[_ROW_BO:_ROW_BO + 1, 0:D]
    b_2   = p_ref[_ROW_B2:_ROW_B2 + 1, 0:D]
    b_qkv = p_ref[_ROW_BQKV:_ROW_BQKV + 1, 0:3 * D]
    b_1   = p_ref[_ROW_B1:_ROW_B1 + 1, 0:F]

    def layernorm(v, g, b):
        # Matches bertmodel.LayerNorm: a_2 * (x - mean) / (std + eps) + b_2, unbiased std.
        mean = jnp.mean(v, axis=-1, keepdims=True)
        var = jnp.sum((v - mean) ** 2, axis=-1, keepdims=True) * (1.0 / (D - 1))
        inv = 1.0 / (jnp.sqrt(var) + EPS)             # exact: LN output feeds every matmul
        return g * ((v - mean) * inv) + b

    # ---------------- sublayer 0: pre-norm multi-head self-attention + residual ------------
    n1 = layernorm(xb, ln1_a, ln1_b)
    # Fused QKV projection over ALL B*S rows: one (M, D) x (D, 3D) MXU matmul, f32 accumulate.
    qkv = jnp.dot(n1.astype(mdt), wqkv_ref[...],
                  preferred_element_type=f32) + b_qkv                     # (M, 3D)

    def heads(t):                                     # (M, D) -> (B*H, S, dk)
        t = t.reshape(batch, seq, H, dk)
        t = jnp.transpose(t, (0, 2, 1, 3))            # minor (lane) dim unchanged
        return t.reshape(batch * H, seq, dk)

    q = heads(qkv[:, 0:D])
    k = heads(qkv[:, D:2 * D])
    v = heads(qkv[:, 2 * D:3 * D])

    # All (batch, head) pairs in one batched contraction.
    scores = jnp.einsum("nqd,nkd->nqk", q.astype(mdt), k.astype(mdt),
                        preferred_element_type=f32) * scale               # (B*H, S, S) f32

    # mask_ref is a bf16 {0,1} "keep" array (exact values produced by the wrapper), so the
    # == 0 compare is robust; semantics identical to masked_fill(mask == 0, -1e9).
    # Note: a fully-masked query row yields uniform attention over its keys, exactly like
    # the PyTorch reference.
    mask0 = mask_ref[...] == 0                                            # (B, S, S) bool
    mask0 = jnp.broadcast_to(mask0[:, None, :, :],
                             (batch, H, seq, seq)).reshape(batch * H, seq, seq)
    scores = jnp.where(mask0, -1e9, scores)

    m = jnp.max(scores, axis=-1, keepdims=True)
    p = jnp.exp(scores - m)
    p = p * pl.reciprocal(jnp.sum(p, axis=-1, keepdims=True), approx=True)  # softmax (EUP)

    ctx = jnp.einsum("nqk,nkd->nqd", p.astype(mdt), v.astype(mdt),
                     preferred_element_type=f32)                          # (B*H, S, dk)
    # Merge heads back to (M, D) with one relayout, then one (M, D) x (D, D) matmul.
    ctx = jnp.transpose(ctx.reshape(batch, H, seq, dk), (0, 2, 1, 3)).reshape(M, D)
    attn_out = jnp.dot(ctx.astype(mdt), wo_ref[...],
                       preferred_element_type=f32) + b_o
    x1 = xb + attn_out                                # residual in f32, stays in VMEM

    # ---------------- sublayer 1: pre-norm feed-forward + residual --------------------------
    n2 = layernorm(x1, ln2_a, ln2_b)
    h = jnp.dot(n2.astype(mdt), w1_ref[...], preferred_element_type=f32) + b_1
    h = jnp.maximum(h, 0.0)                           # ReLU in f32
    ffn = jnp.dot(h.astype(mdt), w2_ref[...], preferred_element_type=f32) + b_2

    # D=32 < 128 so this store is lane-masked; with a single grid step and a 2 KiB output the
    # cost is negligible, and at real model dims (D a multiple of 128) it becomes lane-dense
    # automatically.  TODO(synk): pack the output to (rows, k*128) if small-D at scale matters.
    o_ref[...] = (x1 + ffn).astype(o_ref.dtype)


def encoder_layer(x, mask, params, *, num_heads, matmul_dtype=jnp.bfloat16):
    B, S, D = x.shape
    assert D % num_heads == 0
    F = params["w1"].shape[-1]
    M = B * S

    # Fuse QKV weights once; cast matmul weights to bf16 (halves weight DMA, bf16 MXU peak).
    w_qkv = jnp.concatenate([params["wq"], params["wk"], params["wv"]],
                            axis=1).astype(matmul_dtype)                  # (D, 3D)
    wo = params["wo"].astype(matmul_dtype)
    w1 = params["w1"].astype(matmul_dtype)
    w2 = params["w2"].astype(matmul_dtype)

    # Pack all small (1, n) params into ONE f32 slab; each param on its own row (lane 0
    # aligned) so the kernel reads them with static slices.
    PW = max(3 * D, F)
    b_qkv = jnp.concatenate([params["bq"], params["bk"], params["bv"]], axis=1)  # (1, 3D)
    rows = [None] * _NUM_PARAM_ROWS
    rows[_ROW_LN1_A] = params["ln1_a"]
    rows[_ROW_LN1_B] = params["ln1_b"]
    rows[_ROW_LN2_A] = params["ln2_a"]
    rows[_ROW_LN2_B] = params["ln2_b"]
    rows[_ROW_BO] = params["bo"]
    rows[_ROW_B2] = params["b2"]
    rows[_ROW_BQKV] = b_qkv
    rows[_ROW_B1] = params["b1"]
    slab = jnp.zeros((_NUM_PARAM_ROWS, PW), jnp.float32)
    for i, r in enumerate(rows):
        slab = slab.at[i, : r.shape[-1]].set(r.reshape(-1).astype(jnp.float32))

    # Batch folded into the matmul M dimension; mask shipped as compact bf16 {0,1}.
    x2d = x.reshape(M, D)
    mask_keep = (mask != 0).astype(matmul_dtype)      # exact 0.0 / 1.0 values

    def full(shape):
        return pl.BlockSpec(shape, lambda i, _s=shape: (0,) * len(_s))

    out2d = pl.pallas_call(
        functools.partial(encoder_layer_kernel, num_heads=num_heads, batch=B, seq=S),
        out_shape=jax.ShapeDtypeStruct((M, D), x.dtype),
        grid=(1,),                                    # single step: overhead paid once
        in_specs=[full((M, D)), full((B, S, S)), full((_NUM_PARAM_ROWS, PW)),
                  full((D, 3 * D)), full((D, D)), full((D, F)), full((F, D))],
        out_specs=full((M, D)),
        compiler_params=pltpu.CompilerParams(dimension_semantics=("arbitrary",)),
    )(x2d, mask_keep, slab, w_qkv, wo, w1, w2)
    return out2d.reshape(B, S, D)


def encoder_layer_ref(x, mask, params, *, num_heads):
    # Pure-JAX f32 reference mirroring the PyTorch forward, for a sanity check.
    def ln(v, g, b):
        d = v.shape[-1]
        mean = jnp.mean(v, axis=-1, keepdims=True)
        var = jnp.sum((v - mean) ** 2, axis=-1, keepdims=True) / (d - 1)
        return g * (v - mean) / (jnp.sqrt(var) + EPS) + b

    B, S, D = x.shape
    dk = D // num_heads
    n = ln(x, params["ln1_a"], params["ln1_b"])
    q = n @ params["wq"] + params["bq"]
    k = n @ params["wk"] + params["bk"]
    v = n @ params["wv"] + params["bv"]
    q = q.reshape(B, S, num_heads, dk).transpose(0, 2, 1, 3)
    k = k.reshape(B, S, num_heads, dk).transpose(0, 2, 1, 3)
    v = v.reshape(B, S, num_heads, dk).transpose(0, 2, 1, 3)
    scores = jnp.einsum("bhqd,bhkd->bhqk", q, k) / math.sqrt(dk)
    scores = jnp.where(mask[:, None, :, :] == 0, -1e9, scores)
    p = jax.nn.softmax(scores, axis=-1)
    attn = jnp.einsum("bhqk,bhkd->bhqd", p, v).transpose(0, 2, 1, 3).reshape(B, S, D)
    x1 = x + (attn @ params["wo"] + params["bo"])
    n2 = ln(x1, params["ln2_a"], params["ln2_b"])
    ff = jnp.maximum(n2 @ params["w1"] + params["b1"], 0.0) @ params["w2"] + params["b2"]
    return x1 + ff


if __name__ == "__main__":
    B, S, D, H, D_FF = 2, 8, 32, 4, 64

    keys = jax.random.split(jax.random.PRNGKey(0), 13)

    def w(k, shape, scale=0.05):
        return (scale * jax.random.normal(k, shape)).astype(jnp.float32)

    params = {
        "ln1_a": jnp.ones((1, D), jnp.float32), "ln1_b": jnp.zeros((1, D), jnp.float32),
        "ln2_a": jnp.ones((1, D), jnp.float32), "ln2_b": jnp.zeros((1, D), jnp.float32),
        "wq": w(keys[0], (D, D)), "bq": w(keys[1], (1, D)),
        "wk": w(keys[2], (D, D)), "bk": w(keys[3], (1, D)),
        "wv": w(keys[4], (D, D)), "bv": w(keys[5], (1, D)),
        "wo": w(keys[6], (D, D)), "bo": w(keys[7], (1, D)),
        "w1": w(keys[8], (D, D_FF)), "b1": w(keys[9], (1, D_FF)),
        "w2": w(keys[10], (D_FF, D)), "b2": w(keys[11], (1, D)),
    }

    x = jax.random.normal(keys[12], (B, S, D), jnp.float32)
    mask = jnp.ones((B, S, S), jnp.float32)
    mask = mask.at[1, :, 6:].set(0.0)  # mask out the last two keys of batch 1

    out = encoder_layer(x, mask, params, num_heads=H)
    out = jax.block_until_ready(out)

    ref = encoder_layer_ref(x, mask, params, num_heads=H)
    assert out.shape == (B, S, D)
    # bf16 MXU operands + the approx (EUP) softmax reciprocal introduce ~1e-3-level absolute
    # differences from the pure-f32 reference.
    assert jnp.allclose(out, ref, atol=2e-3, rtol=2e-3), "mismatch vs reference"

    print("KERNEL_OK")
</pallas_src>

<mosaic_0001>
module attributes {stable_mosaic.version = 11 : i64} {
  func.func @encoder_layer_kernel(%arg0: i32, %arg1: memref<16x32xf32, #tpu.memory_space<vmem>>, %arg2: memref<2x8x8xbf16, #tpu.memory_space<vmem>>, %arg3: memref<8x96xf32, #tpu.memory_space<vmem>>, %arg4: memref<32x96xbf16, #tpu.memory_space<vmem>>, %arg5: memref<32x32xbf16, #tpu.memory_space<vmem>>, %arg6: memref<32x64xbf16, #tpu.memory_space<vmem>>, %arg7: memref<64x32xbf16, #tpu.memory_space<vmem>>, %arg8: memref<16x32xf32, #tpu.memory_space<vmem>>) attributes {dimension_semantics = [#tpu.dimension_semantics<arbitrary>], iteration_bounds = array<i64: 1>, scalar_prefetch = 0 : i64, scratch_operands = 0 : i64, tpu.core_type = #tpu.core_type<tc>, window_params = [{pipeline_mode = #tpu.pipeline_mode<synchronous>, transform_indices = @transform_0, window_bounds = array<i64: 16, 32>}, {pipeline_mode = #tpu.pipeline_mode<synchronous>, transform_indices = @transform_1, window_bounds = array<i64: 2, 8, 8>}, {pipeline_mode = #tpu.pipeline_mode<synchronous>, transform_indices = @transform_2, window_bounds = array<i64: 8, 96>}, {pipeline_mode = #tpu.pipeline_mode<synchronous>, transform_indices = @transform_3, window_bounds = array<i64: 32, 96>}, {pipeline_mode = #tpu.pipeline_mode<synchronous>, transform_indices = @transform_4, window_bounds = array<i64: 32, 32>}, {pipeline_mode = #tpu.pipeline_mode<synchronous>, transform_indices = @transform_5, window_bounds = array<i64: 32, 64>}, {pipeline_mode = #tpu.pipeline_mode<synchronous>, transform_indices = @transform_6, window_bounds = array<i64: 64, 32>}, {pipeline_mode = #tpu.pipeline_mode<synchronous>, transform_indices = @transform_7, window_bounds = array<i64: 16, 32>}]} {
    %c0 = arith.constant 0 : index
    %c0_0 = arith.constant 0 : index
    %0 = vector.load %arg1[%c0, %c0_0] : memref<16x32xf32, #tpu.memory_space<vmem>>, vector<16x32xf32>
    %c0_1 = arith.constant 0 : index
    %c0_2 = arith.constant 0 : index
    %1 = vector.load %arg3[%c0_1, %c0_2] : memref<8x96xf32, #tpu.memory_space<vmem>>, vector<1x32xf32>
    %c1 = arith.constant 1 : index
    %c0_3 = arith.constant 0 : index
    %2 = vector.load %arg3[%c1, %c0_3] : memref<8x96xf32, #tpu.memory_space<vmem>>, vector<1x32xf32>
    %c2 = arith.constant 2 : index
    %c0_4 = arith.constant 0 : index
    %3 = vector.load %arg3[%c2, %c0_4] : memref<8x96xf32, #tpu.memory_space<vmem>>, vector<1x32xf32>
    %c3 = arith.constant 3 : index
    %c0_5 = arith.constant 0 : index
    %4 = vector.load %arg3[%c3, %c0_5] : memref<8x96xf32, #tpu.memory_space<vmem>>, vector<1x32xf32>
    %c4 = arith.constant 4 : index
    %c0_6 = arith.constant 0 : index
    %5 = vector.load %arg3[%c4, %c0_6] : memref<8x96xf32, #tpu.memory_space<vmem>>, vector<1x32xf32>
    %c5 = arith.constant 5 : index
    %c0_7 = arith.constant 0 : index
    %6 = vector.load %arg3[%c5, %c0_7] : memref<8x96xf32, #tpu.memory_space<vmem>>, vector<1x32xf32>
    %c6 = arith.constant 6 : index
    %c0_8 = arith.constant 0 : index
    %7 = vector.load %arg3[%c6, %c0_8] : memref<8x96xf32, #tpu.memory_space<vmem>>, vector<1x96xf32>
    %c7 = arith.constant 7 : index
    %c0_9 = arith.constant 0 : index
    %8 = vector.load %arg3[%c7, %c0_9] : memref<8x96xf32, #tpu.memory_space<vmem>>, vector<1x64xf32>
    %cst = arith.constant dense<0.000000e+00> : vector<16xf32>
    %9 = vector.multi_reduction <add>, %0, %cst [1] : vector<16x32xf32> to vector<16xf32>
    %10 = vector.shape_cast %9 : vector<16xf32> to vector<16x1xf32>
    %cst_10 = arith.constant 3.200000e+01 : f32
    %11 = vector.broadcast %cst_10 : f32 to vector<16x1xf32>
    %12 = arith.divf %10, %11 : vector<16x1xf32>
    %13 = vector.broadcast %12 : vector<16x1xf32> to vector<16x32xf32>
    %14 = arith.subf %0, %13 : vector<16x32xf32>
    %15 = arith.mulf %14, %14 : vector<16x32xf32>
    %cst_11 = arith.constant dense<0.000000e+00> : vector<16xf32>
    %16 = vector.multi_reduction <add>, %15, %cst_11 [1] : vector<16x32xf32> to vector<16xf32>
    %17 = vector.shape_cast %16 : vector<16xf32> to vector<16x1xf32>
    %cst_12 = arith.constant 0.0322580636 : f32
    %18 = vector.broadcast %cst_12 : f32 to vector<16x1xf32>
    %19 = arith.mulf %17, %18 : vector<16x1xf32>
    %20 = math.sqrt %19 : vector<16x1xf32>
    %cst_13 = arith.constant 9.99999997E-7 : f32
    %21 = vector.broadcast %cst_13 : f32 to vector<16x1xf32>
    %22 = arith.addf %20, %21 : vector<16x1xf32>
    %cst_14 = arith.constant 1.000000e+00 : f32
    %23 = vector.broadcast %cst_14 : f32 to vector<16x1xf32>
    %24 = arith.divf %23, %22 : vector<16x1xf32>
    %25 = vector.broadcast %12 : vector<16x1xf32> to vector<16x32xf32>
    %26 = arith.subf %0, %25 : vector<16x32xf32>
    %27 = vector.broadcast %24 : vector<16x1xf32> to vector<16x32xf32>
    %28 = arith.mulf %26, %27 : vector<16x32xf32>
    %29 = vector.broadcast %1 : vector<1x32xf32> to vector<16x32xf32>
    %30 = arith.mulf %29, %28 : vector<16x32xf32>
    %31 = vector.broadcast %2 : vector<1x32xf32> to vector<16x32xf32>
    %32 = arith.addf %30, %31 : vector<16x32xf32>
    %33 = arith.truncf %32 : vector<16x32xf32> to vector<16x32xbf16>
    %c0_15 = arith.constant 0 : index
    %c0_16 = arith.constant 0 : index
    %34 = vector.load %arg4[%c0_15, %c0_16] : memref<32x96xbf16, #tpu.memory_space<vmem>>, vector<32x96xbf16>
    %cst_17 = arith.constant dense<0.000000e+00> : vector<16x96xf32>
    %35 = tpu.matmul %33, %34, %cst_17 {dimension_numbers = #tpu.dot_dimension_numbers<[1], [0], [0], [1], [0, 0, 1, 1], [], []>} : vector<16x32xbf16>, vector<32x96xbf16>, vector<16x96xf32> -> vector<16x96xf32>
    %36 = vector.broadcast %7 : vector<1x96xf32> to vector<16x96xf32>
    %37 = arith.addf %35, %36 : vector<16x96xf32>
    %38 = vector.extract_strided_slice %37 {offsets = [0, 0], sizes = [16, 32], strides = [1, 1]} : vector<16x96xf32> to vector<16x32xf32>
    %39 = vector.shape_cast %38 : vector<16x32xf32> to vector<2x8x4x8xf32>
    %40 = tpu.transpose %39, [0, 2, 1, 3] : vector<2x8x4x8xf32> -> vector<2x4x8x8xf32>
    %41 = vector.shape_cast %40 : vector<2x4x8x8xf32> to vector<8x8x8xf32>
    %42 = vector.extract_strided_slice %37 {offsets = [0, 32], sizes = [16, 32], strides = [1, 1]} : vector<16x96xf32> to vector<16x32xf32>
    %43 = vector.shape_cast %42 : vector<16x32xf32> to vector<2x8x4x8xf32>
    %44 = tpu.transpose %43, [0, 2, 1, 3] : vector<2x8x4x8xf32> -> vector<2x4x8x8xf32>
    %45 = vector.shape_cast %44 : vector<2x4x8x8xf32> to vector<8x8x8xf32>
    %46 = vector.extract_strided_slice %37 {offsets = [0, 64], sizes = [16, 32], strides = [1, 1]} : vector<16x96xf32> to vector<16x32xf32>
    %47 = vector.shape_cast %46 : vector<16x32xf32> to vector<2x8x4x8xf32>
    %48 = tpu.transpose %47, [0, 2, 1, 3] : vector<2x8x4x8xf32> -> vector<2x4x8x8xf32>
    %49 = vector.shape_cast %48 : vector<2x4x8x8xf32> to vector<8x8x8xf32>
    %50 = arith.truncf %41 : vector<8x8x8xf32> to vector<8x8x8xbf16>
    %51 = arith.truncf %45 : vector<8x8x8xf32> to vector<8x8x8xbf16>
    "tpu.trace_start"() <{level = 10 : i32, message = "nqd,nkd->nqk"}> : () -> ()
    %cst_18 = arith.constant dense<0.000000e+00> : vector<8x8x8xf32>
    %52 = tpu.matmul %50, %51, %cst_18 {dimension_numbers = #tpu.dot_dimension_numbers<[2], [2], [1], [1], [0, 0, 0, 1, 1, 1], [0], [0]>} : vector<8x8x8xbf16>, vector<8x8x8xbf16>, vector<8x8x8xf32> -> vector<8x8x8xf32>
    "tpu.trace_stop"() : () -> ()
    %cst_19 = arith.constant 0.353553385 : f32
    %53 = vector.broadcast %cst_19 : f32 to vector<8x8x8xf32>
    %54 = arith.mulf %52, %53 : vector<8x8x8xf32>
    %c0_20 = arith.constant 0 : index
    %c0_21 = arith.constant 0 : index
    %c0_22 = arith.constant 0 : index
    %55 = vector.load %arg2[%c0_20, %c0_21, %c0_22] : memref<2x8x8xbf16, #tpu.memory_space<vmem>>, vector<2x8x8xbf16>
    %cst_23 = arith.constant 0.000000e+00 : bf16
    %56 = vector.broadcast %cst_23 : bf16 to vector<2x8x8xbf16>
    %57 = arith.cmpf oeq, %55, %56 : vector<2x8x8xbf16>
    %58 = vector.shape_cast %57 : vector<2x8x8xi1> to vector<2x1x8x8xi1>
    %59 = vector.shape_cast %58 : vector<2x1x8x8xi1> to vector<2x1x8x8xi1>
    %60 = vector.broadcast %59 : vector<2x1x8x8xi1> to vector<2x4x8x8xi1>
    %61 = vector.shape_cast %60 : vector<2x4x8x8xi1> to vector<8x8x8xi1>
    %cst_24 = arith.constant -1.000000e+09 : f32
    %62 = vector.broadcast %cst_24 : f32 to vector<8x8x8xf32>
    %63 = arith.select %61, %62, %54 : vector<8x8x8xi1>, vector<8x8x8xf32>
    %cst_25 = arith.constant dense<0xFF800000> : vector<8x8xf32>
    %64 = vector.multi_reduction <maximumf>, %63, %cst_25 [2] : vector<8x8x8xf32> to vector<8x8xf32>
    %65 = vector.shape_cast %64 : vector<8x8xf32> to vector<8x8x1xf32>
    %66 = vector.broadcast %65 : vector<8x8x1xf32> to vector<8x8x8xf32>
    %67 = arith.subf %63, %66 : vector<8x8x8xf32>
    %68 = math.exp %67 : vector<8x8x8xf32>
    %cst_26 = arith.constant dense<0.000000e+00> : vector<8x8xf32>
    %69 = vector.multi_reduction <add>, %68, %cst_26 [2] : vector<8x8x8xf32> to vector<8x8xf32>
    %70 = vector.shape_cast %69 : vector<8x8xf32> to vector<8x8x1xf32>
    %71 = tpu.reciprocal %70 {approx = true} : vector<8x8x1xf32> -> vector<8x8x1xf32>
    %72 = vector.broadcast %71 : vector<8x8x1xf32> to vector<8x8x8xf32>
    %73 = arith.mulf %68, %72 : vector<8x8x8xf32>
    %74 = arith.truncf %73 : vector<8x8x8xf32> to vector<8x8x8xbf16>
    %75 = arith.truncf %49 : vector<8x8x8xf32> to vector<8x8x8xbf16>
    "tpu.trace_start"() <{level = 10 : i32, message = "nqk,nkd->nqd"}> : () -> ()
    %cst_27 = arith.constant dense<0.000000e+00> : vector<8x8x8xf32>
    %76 = tpu.matmul %74, %75, %cst_27 {dimension_numbers = #tpu.dot_dimension_numbers<[2], [1], [1], [2], [0, 0, 0, 1, 1, 2], [0], [0]>} : vector<8x8x8xbf16>, vector<8x8x8xbf16>, vector<8x8x8xf32> -> vector<8x8x8xf32>
    "tpu.trace_stop"() : () -> ()
    %77 = vector.shape_cast %76 : vector<8x8x8xf32> to vector<2x4x8x8xf32>
    %78 = tpu.transpose %77, [0, 2, 1, 3] : vector<2x4x8x8xf32> -> vector<2x8x4x8xf32>
    %79 = vector.shape_cast %78 : vector<2x8x4x8xf32> to vector<16x32xf32>
    %80 = arith.truncf %79 : vector<16x32xf32> to vector<16x32xbf16>
    %c0_28 = arith.constant 0 : index
    %c0_29 = arith.constant 0 : index
    %81 = vector.load %arg5[%c0_28, %c0_29] : memref<32x32xbf16, #tpu.memory_space<vmem>>, vector<32x32xbf16>
    %cst_30 = arith.constant dense<0.000000e+00> : vector<16x32xf32>
    %82 = tpu.matmul %80, %81, %cst_30 {dimension_numbers = #tpu.dot_dimension_numbers<[1], [0], [0], [1], [0, 0, 1, 1], [], []>} : vector<16x32xbf16>, vector<32x32xbf16>, vector<16x32xf32> -> vector<16x32xf32>
    %83 = vector.broadcast %5 : vector<1x32xf32> to vector<16x32xf32>
    %84 = arith.addf %82, %83 : vector<16x32xf32>
    %85 = arith.addf %0, %84 : vector<16x32xf32>
    %cst_31 = arith.constant dense<0.000000e+00> : vector<16xf32>
    %86 = vector.multi_reduction <add>, %85, %cst_31 [1] : vector<16x32xf32> to vector<16xf32>
    %87 = vector.shape_cast %86 : vector<16xf32> to vector<16x1xf32>
    %cst_32 = arith.constant 3.200000e+01 : f32
    %88 = vector.broadcast %cst_32 : f32 to vector<16x1xf32>
    %89 = arith.divf %87, %88 : vector<16x1xf32>
    %90 = vector.broadcast %89 : vector<16x1xf32> to vector<16x32xf32>
    %91 = arith.subf %85, %90 : vector<16x32xf32>
    %92 = arith.mulf %91, %91 : vector<16x32xf32>
    %cst_33 = arith.constant dense<0.000000e+00> : vector<16xf32>
    %93 = vector.multi_reduction <add>, %92, %cst_33 [1] : vector<16x32xf32> to vector<16xf32>
    %94 = vector.shape_cast %93 : vector<16xf32> to vector<16x1xf32>
    %cst_34 = arith.constant 0.0322580636 : f32
    %95 = vector.broadcast %cst_34 : f32 to vector<16x1xf32>
    %96 = arith.mulf %94, %95 : vector<16x1xf32>
    %97 = math.sqrt %96 : vector<16x1xf32>
    %cst_35 = arith.constant 9.99999997E-7 : f32
    %98 = vector.broadcast %cst_35 : f32 to vector<16x1xf32>
    %99 = arith.addf %97, %98 : vector<16x1xf32>
    %cst_36 = arith.constant 1.000000e+00 : f32
    %100 = vector.broadcast %cst_36 : f32 to vector<16x1xf32>
    %101 = arith.divf %100, %99 : vector<16x1xf32>
    %102 = vector.broadcast %89 : vector<16x1xf32> to vector<16x32xf32>
    %103 = arith.subf %85, %102 : vector<16x32xf32>
    %104 = vector.broadcast %101 : vector<16x1xf32> to vector<16x32xf32>
    %105 = arith.mulf %103, %104 : vector<16x32xf32>
    %106 = vector.broadcast %3 : vector<1x32xf32> to vector<16x32xf32>
    %107 = arith.mulf %106, %105 : vector<16x32xf32>
    %108 = vector.broadcast %4 : vector<1x32xf32> to vector<16x32xf32>
    %109 = arith.addf %107, %108 : vector<16x32xf32>
    %110 = arith.truncf %109 : vector<16x32xf32> to vector<16x32xbf16>
    %c0_37 = arith.constant 0 : index
    %c0_38 = arith.constant 0 : index
    %111 = vector.load %arg6[%c0_37, %c0_38] : memref<32x64xbf16, #tpu.memory_space<vmem>>, vector<32x64xbf16>
    %cst_39 = arith.constant dense<0.000000e+00> : vector<16x64xf32>
    %112 = tpu.matmul %110, %111, %cst_39 {dimension_numbers = #tpu.dot_dimension_numbers<[1], [0], [0], [1], [0, 0, 1, 1], [], []>} : vector<16x32xbf16>, vector<32x64xbf16>, vector<16x64xf32> -> vector<16x64xf32>
    %113 = vector.broadcast %8 : vector<1x64xf32> to vector<16x64xf32>
    %114 = arith.addf %112, %113 : vector<16x64xf32>
    %cst_40 = arith.constant 0.000000e+00 : f32
    %115 = vector.broadcast %cst_40 : f32 to vector<16x64xf32>
    %116 = arith.maximumf %114, %115 : vector<16x64xf32>
    %117 = arith.truncf %116 : vector<16x64xf32> to vector<16x64xbf16>
    %c0_41 = arith.constant 0 : index
    %c0_42 = arith.constant 0 : index
    %118 = vector.load %arg7[%c0_41, %c0_42] : memref<64x32xbf16, #tpu.memory_space<vmem>>, vector<64x32xbf16>
    %cst_43 = arith.constant dense<0.000000e+00> : vector<16x32xf32>
    %119 = tpu.matmul %117, %118, %cst_43 {dimension_numbers = #tpu.dot_dimension_numbers<[1], [0], [0], [1], [0, 0, 1, 1], [], []>} : vector<16x64xbf16>, vector<64x32xbf16>, vector<16x32xf32> -> vector<16x32xf32>
    %120 = vector.broadcast %6 : vector<1x32xf32> to vector<16x32xf32>
    %121 = arith.addf %119, %120 : vector<16x32xf32>
    %122 = arith.addf %85, %121 : vector<16x32xf32>
    %c0_44 = arith.constant 0 : index
    %c0_45 = arith.constant 0 : index
    %123 = vector.load %arg8[%c0_44, %c0_45] : memref<16x32xf32, #tpu.memory_space<vmem>>, vector<16x32xf32>
    tpu.vector_store %arg8[%c0_44, %c0_45], %122 {strides = array<i32>} : memref<16x32xf32, #tpu.memory_space<vmem>>, vector<16x32xf32>,
    return
  }
  func.func @transform_0(%arg0: i32) -> (i32, i32) {
    %c0_i32 = arith.constant 0 : i32
    %c0_i32_0 = arith.constant 0 : i32
    %c0_i32_1 = arith.constant 0 : i32
    return %c0_i32, %c0_i32_0 : i32, i32
  }
  func.func @transform_1(%arg0: i32) -> (i32, i32, i32) {
    %c0_i32 = arith.constant 0 : i32
    %c0_i32_0 = arith.constant 0 : i32
    %c0_i32_1 = arith.constant 0 : i32
    %c0_i32_2 = arith.constant 0 : i32
    return %c0_i32, %c0_i32_0, %c0_i32_1 : i32, i32, i32
  }
  func.func @transform_2(%arg0: i32) -> (i32, i32) {
    %c0_i32 = arith.constant 0 : i32
    %c0_i32_0 = arith.constant 0 : i32
    %c0_i32_1 = arith.constant 0 : i32
    return %c0_i32, %c0_i32_0 : i32, i32
  }
  func.func @transform_3(%arg0: i32) -> (i32, i32) {
    %c0_i32 = arith.constant 0 : i32
    %c0_i32_0 = arith.constant 0 : i32
    %c0_i32_1 = arith.constant 0 : i32
    return %c0_i32, %c0_i32_0 : i32, i32
  }
  func.func @transform_4(%arg0: i32) -> (i32, i32) {
    %c0_i32 = arith.constant 0 : i32
    %c0_i32_0 = arith.constant 0 : i32
    %c0_i32_1 = arith.constant 0 : i32
    return %c0_i32, %c0_i32_0 : i32, i32
  }
  func.func @transform_5(%arg0: i32) -> (i32, i32) {
    %c0_i32 = arith.constant 0 : i32
    %c0_i32_0 = arith.constant 0 : i32
    %c0_i32_1 = arith.constant 0 : i32
    return %c0_i32, %c0_i32_0 : i32, i32
  }
  func.func @transform_6(%arg0: i32) -> (i32, i32) {
    %c0_i32 = arith.constant 0 : i32
    %c0_i32_0 = arith.constant 0 : i32
    %c0_i32_1 = arith.constant 0 : i32
    return %c0_i32, %c0_i32_0 : i32, i32
  }
  func.func @transform_7(%arg0: i32) -> (i32, i32) {
    %c0_i32 = arith.constant 0 : i32
    %c0_i32_0 = arith.constant 0 : i32
    %c0_i32_1 = arith.constant 0 : i32
    return %c0_i32, %c0_i32_0 : i32, i32
  }
}

</mosaic_0001>

<bundles_post_ra>
// kernel: tpu_custom_call.1
= control target key start
LH: loop header
LB: loop body
LE: loop exit
PB: predicated region body
PF: predicated region fallthrough
CT: control target
= control target key end

     0   :  { %12 = vsyncpa [#allocation3], 0  ;;  %s2862_s0 = inlined_call_operand.vmem [shape: f32[16,32], index: 0, kind: input, shape index: {}]   ;;  %s2863_s1 = inlined_call_operand.hbm [shape: bf16[2,8,8], index: 1, kind: input, shape index: {}]   ;;  %s2864_s2 = inlined_call_operand.hbm [shape: f32[8,96], index: 2, kind: input, shape index: {}]   ;;  %s2865_s3 = inlined_call_operand.vmem [shape: bf16[32,96], index: 3, kind: input, shape index: {}]   ;;  %s2866_s4 = inlined_call_operand.vmem [shape: bf16[32,32], index: 4, kind: input, shape index: {}]   ;;  %s2867_s5 = inlined_call_operand.hbm [shape: bf16[32,64], index: 5, kind: input, shape index: {}]   ;;  %s2868_s6 = inlined_call_operand.vmem [shape: bf16[64,32], index: 6, kind: input, shape index: {}]   ;;  %s2869_s7 = inlined_call_operand.hbm [shape: f32[16,32], index: 7, kind: output, shape index: {}]  }
   0x1   :  { %13 = vsyncpa [#allocation6], 0  ;;  %s35_s26 = sshll.u32 %s2864_s2, 4  ;;  %s36_s26 = int_to_ptr.hbm [resolvable:$true] %s35_s26 }
   0x2   :  { %14 = vsyncpa [#allocation4], 0  ;;  %s2185_s27 = smov [#allocation5]   ;;  %s21_s8 = sshll.u32 %s2863_s1, 4  ;;  %s22_s8 = int_to_ptr.hbm [resolvable:$true] %s21_s8 }
   0x3   :  { %s37_s28 = sshll.u32 %s2185_s27, 4  ;;  %s2186_s9 = smov [#allocation2]   ;;  %s38_s28 = int_to_ptr.vmem [resolvable:$true] %s37_s28 }
   0x4   :  { %40 = dma.hbm_to_vmem [thread:$0]  %s36_s26, 128, %s38_s28, [#allocation6]  }
   0x5   :  { %s23_s10 = sshll.u32 %s2186_s9, 4  ;;  %s2187_s11 = smov 64   ;;  %s24_s10 = int_to_ptr.vmem [resolvable:$true] %s23_s10 }
   0x6   :  { %s2188_s12 = smov 4   ;;  %s49_s14 = sshll.u32 %s2867_s5, 4  ;;  %s50_s14 = int_to_ptr.hbm [resolvable:$true] %s49_s14 }
   0x7   :  { %29 = dma.hbm_to_vmem [thread:$0]  %s22_s8, 128, %s24_s10, [#allocation3], %s2187_s11, %s2187_s11, %s2188_s12  }
   0x8   :  { %s2189_s15 = smov [#allocation7]  }
   0x9   :  { %s51_s16 = sshll.u32 %s2189_s15, 4  ;;  %s52_s16 = int_to_ptr.vmem [resolvable:$true] %s51_s16 }
   0xa   :  { %57 = dma.hbm_to_vmem [thread:$0]  %s50_s14, 256, %s52_s16, [#allocation6], %s2187_s11, %s2187_s11, %s2188_s12  }
   0xb   :  { %2179 = dma.done.wait [#allocation3], 128  }
   0xc   :  { %2180 = vsyncadd [#allocation3], 4294967168 }
   0xd   :  { %2181 = dma.done.wait [#allocation6], 384  }
   0xe   :  { %2182 = vsyncadd [#allocation6], 4294966912  ;;  %vm83_vm0 = vcmask 261120   ;;  %v73_v0 = vld [vmem:[%s2862_s0] sm:$0xff]  ;;  %v74_v2 = vld [vmem:[%s2862_s0 + $0x8] sm:$0xff]  ;;  %v2190_v4 = vmov 32.0  }
   0xf   :  { %v84_v1 = vsel %vm83_vm0, %v73_v0, 0.0  ;;  %v87_v3 = vsel %vm83_vm0, %v74_v2, 0.0  ;;  %2031 = vrcp.f32 %v2190_v4  ;;  %v1938_v21 = vld [vmem:[%s2865_s3 + $0x8] sm:$0xff]  ;;  %v1937_v23 = vld [vmem:[%s2865_s3] sm:$0xff]  ;;  %s2191_s3 = smov 104   ;;  %s2192_s23 = smov 120  }
  0x10   :  { %85 = vadd.xlane.f32.xlu0 %v84_v1  ;;  %202 = vmatpush.bf16.msra.mxu0 %v1938_v21  ;;  %s2193_s24 = smov 112   ;;  %s2194_s25 = smov 96   ;;  %vm231_vm14 = vcmask 1047556   ;;  %vm955_vm15 = vcmask 64512  }
  0x11   :  { %s2197_s26 = smov 16   ;;  %s2198_s27 = smov 24  }
  0x12   :  { %s2199_s28 = smov 8   ;;  %s1863_s18 = sshll.u32 %s2869_s7, 4  ;;  %s1864_s18 = int_to_ptr.hbm [resolvable:$true] %s1863_s18 }
  0x13   :  { %s2200_s19 = smov [#allocation8]   ;;  %s2201_s21 = smov 128  }
  0x14   :  { %203 = vmatpush.bf16.msra.mxu0 %v1937_v23  ;;  %v2195_v23 = vmov 1983009808   ;;  %s1861_s20 = sshll.u32 %s2200_s19, 4  ;;  %s1862_s20 = int_to_ptr.vmem [resolvable:$true] %s1861_s20 }
  0x15   :  { %v2032_v5 = vpop.eup %2031 }
  0x16   :  { %v91_v6 = vmul.f32 32.0, %v2032_v5  ;;  %vm95_vm1 = vweird.f32 %v2032_v5 }
  0x18   :  { %88 = vadd.xlane.f32.xlu0 %v87_v3  ;;  %v92_v7 = vsub.f32 1.0, %v91_v6  ;;  %v2023_v3 = vld [vmem:[#allocation5] ss:$0 sm:$0xff] }
  0x1a   :  { %v93_v8 = vmul.f32 %v2032_v5, %v92_v7 }
  0x1c   :  { %v94_v9 = vadd.f32 %v2032_v5, %v93_v8 }
  0x1e   :  { %v2263_v10 = vsel %vm95_vm1, %v2032_v5, %v94_v9  ;;  %v2024_v9 = vld [vmem:[#allocation5 + $0x1] ss:$0 sm:$0xff] }
  0x83   :  { %v86_v11 = vpop.xlane.xlu0 %85 }
  0x84   :  { %v97_v12 = vmul.f32 %v2263_v10, %v86_v11 }
  0x86   :  { %v2266_v13 = vsub.f32 %v73_v0, %v97_v12 }
  0x88   :  { %v101_v14 = vmul.f32 %v2266_v13, %v2266_v13 }
  0x8a   :  { %v103_v15 = vsel %vm83_vm0, %v101_v14, 0.0 }
  0x8b   :  { %104 = vadd.xlane.f32.xlu1 %v103_v15  ;;  %v89_v16 = vpop.xlane.xlu0 %88 }
  0x8c   :  { %v98_v17 = vmul.f32 %v2263_v10, %v89_v16  ;;  %v2025_v16 = vld [vmem:[#allocation5 + $0x6] ss:$0 sm:$0xff] }
  0x8e   :  { %v2272_v18 = vsub.f32 %v74_v2, %v98_v17 }
  0x90   :  { %v102_v19 = vmul.f32 %v2272_v18, %v2272_v18 }
  0x92   :  { %v106_v20 = vsel %vm83_vm0, %v102_v19, 0.0 }
  0x93   :  { %107 = vadd.xlane.f32.xlu1 %v106_v20 }
  0xfe   :  { %v105_v22 = vpop.xlane.xlu1 %104 }
  0xff   :  { %v109_v24 = vmul.f32 0.032258064, %v105_v22 }
 0x101   :  { %2033 = vrsqrt.f32 %v109_v24  ;;  %vm118_vm2 = vcmp.eq.f32.partialorder %v109_v24, inf  ;;  %v121_v37 = vand.u32 2147483648, %v109_v24  ;;  %vm120_vm3 = vcmp.eq.f32.partialorder %v109_v24, 0.0 }
 0x106   :  { %v108_v25 = vpop.xlane.xlu1 %107 }
 0x107   :  { %v2034_v26 = vpop.eup %2033  ;;  %v110_v27 = vmul.f32 0.032258064, %v108_v25 }
 0x108   :  { %v112_v28 = vmul.f32 %v2034_v26, %v109_v24 }
 0x109   :  { %2035 = vrsqrt.f32 %v110_v27  ;;  %vm130_vm4 = vcmp.eq.f32.partialorder %v110_v27, inf  ;;  %v133_v45 = vand.u32 2147483648, %v110_v27  ;;  %vm132_vm5 = vcmp.eq.f32.partialorder %v110_v27, 0.0 }
 0x10a   :  { %v113_v29 = vmul.f32 %v2034_v26, %v112_v28 }
 0x10c   :  { %v114_v30 = vmul.f32 0.5, %v113_v29 }
 0x10e   :  { %v115_v31 = vsub.f32 1.5, %v114_v30 }
 0x10f   :  { %v2036_v32 = vpop.eup %2035 }
 0x110   :  { %v116_v33 = vmul.f32 %v2034_v26, %v115_v31  ;;  %v124_v34 = vmul.f32 %v2036_v32, %v110_v27  ;;  %v2196_v31 = vmov 1934713408  }
 0x112   :  { %v117_v35 = vmul.f32 %v116_v33, %v109_v24  ;;  %v125_v36 = vmul.f32 %v2036_v32, %v124_v34 }
 0x114   :  { %v119_v38 = vsel %vm118_vm2, %v109_v24, %v117_v35  ;;  %v126_v39 = vmul.f32 0.5, %v125_v36  ;;  %v236_v24 = vunpack.c.l.s4 %v2195_v23 }
 0x115   :  { %v122_v40 = vsel %vm120_vm3, %v121_v37, %v119_v38  ;;  %vm1241_vm3 = vcmask 1043456  }
 0x116   :  { %v127_v41 = vsub.f32 1.5, %v126_v39  ;;  %v135_v42 = vadd.f32 1e-06, %v122_v40  ;;  %v2297_v28 = vunpack.c.0.s8 %v236_v24 }
 0x118   :  { %v128_v43 = vmul.f32 %v2036_v32, %v127_v41  ;;  %2037 = vrcp.f32 %v135_v42  ;;  %v148_v53 = vand.u32 2147483648, %v135_v42  ;;  %vm142_vm7 = vweird.f32 %v135_v42 }
 0x119   :  { %v146_v55 = vand.u32 2147483647, %v135_v42  ;;  %v260_v32 = vunpack.c.l.s4 %v2196_v31 }
 0x11a   :  { %v129_v44 = vmul.f32 %v128_v43, %v110_v27  ;;  %v149_v59 = vor.u32 1.1754944e-38, %v148_v53 }
 0x11b   :  { %vm147_vm9 = vcmp.eq.f32.partialorder %v146_v55, 8.507059e+37  ;;  %v2305_v38 = vunpack.c.0.s8 %v260_v32 }
 0x11c   :  { %v131_v46 = vsel %vm130_vm4, %v110_v27, %v129_v44  ;;  %vm1637_vm4 = vcmask 130048  }
 0x11d   :  { %v134_v47 = vsel %vm132_vm5, %v133_v45, %v131_v46  ;;  %vm1640_vm5 = vcmask 195584  }
 0x11e   :  { %v2038_v48 = vpop.eup %2037  ;;  %v136_v49 = vadd.f32 1e-06, %v134_v47 }
 0x11f   :  { %v138_v50 = vmul.f32 %v2038_v48, %v135_v42  ;;  %vm143_vm6 = vweird.f32 %v2038_v48 }
 0x120   :  { %2039 = vrcp.f32 %v136_v49  ;;  %vm144_vm8 = vmor %vm142_vm7, %vm143_vm6  ;;  %v163_v62 = vand.u32 2147483648, %v136_v49  ;;  %v161_v0 = vand.u32 2147483647, %v136_v49  ;;  %vm157_vm11 = vweird.f32 %v136_v49 }
 0x121   :  { %v139_v51 = vsub.f32 1.0, %v138_v50 }
 0x122   :  { %v164_v4 = vor.u32 1.1754944e-38, %v163_v62  ;;  %vm162_vm13 = vcmp.eq.f32.partialorder %v161_v0, 8.507059e+37 }
 0x123   :  { %v140_v52 = vmul.f32 %v2038_v48, %v139_v51 }
 0x125   :  { %v141_v54 = vadd.f32 %v2038_v48, %v140_v52 }
 0x126   :  { %v2040_v56 = vpop.eup %2039 }
 0x127   :  { %v145_v57 = vsel %vm144_vm8, %v2038_v48, %v141_v54  ;;  %v153_v58 = vmul.f32 %v2040_v56, %v136_v49  ;;  %vm158_vm10 = vweird.f32 %v2040_v56 }
 0x128   :  { %v150_v61 = vsel %vm147_vm9, %v149_v59, %v145_v57  ;;  %vm159_vm12 = vmor %vm157_vm11, %vm158_vm10 }
 0x129   :  { %v154_v60 = vsub.f32 1.0, %v153_v58  ;;  %v167_v2 = vmul.f32 %v150_v61, %v2266_v13 }
 0x12b   :  { %v155_v63 = vmul.f32 %v2040_v56, %v154_v60  ;;  %v170_v8 = vmul.f32 %v2023_v3, %v167_v2 }
 0x12d   :  { %v156_v1 = vadd.f32 %v2040_v56, %v155_v63  ;;  %v173_v12 = vadd.f32 %v2024_v9, %v170_v8 }
 0x12f   :  { %v160_v5 = vsel %vm159_vm12, %v2040_v56, %v156_v1 }
 0x130   :  { %v165_v6 = vsel %vm162_vm13, %v164_v4, %v160_v5 }
 0x131   :  { %v168_v7 = vmul.f32 %v165_v6, %v2272_v18 }
 0x133   :  { %v171_v11 = vmul.f32 %v2023_v3, %v168_v7 }
 0x135   :  { %v174_v14 = vadd.f32 %v2024_v9, %v171_v11 }
 0x137   :  { %v175_v15 = vpack.c.bf16 %v174_v14, %v173_v12 }
 0x139   :  { %1885 = vmatmul.msk.bf16.vlgmr.msra.gmra.mxu0 %vm83_vm0, %v175_v15 }
 0x1b6   :  { %v205_v17 = vpop.f32.mrf.mxu0 }
 0x1b7   :  { %v206_v19 = vadd.f32 %v2025_v16, %v205_v17 }
 0x1b9   :  { %224 = vrot.lane.b32.xlu0 %v206_v19, %s2191_s3  ;;  %212 = vrot.lane.b32.xlu2 %v206_v19, %s2192_s23  ;;  %v233_v27 = vrot.slane %v206_v19, 4 }
 0x1be   :  { %v207_v13 = vpop.f32.mrf.mxu0 }
 0x1bf   :  { %v2286_v20 = vadd.f32 %v2025_v16, %v207_v13 }
 0x1c1   :  { %214 = vrot.lane.b32.xlu1 %v2286_v20, %s2192_s23  ;;  %218 = vrot.lane.b32.xlu2 %v206_v19, %s2193_s24 }
 0x1c9   :  { %220 = vrot.lane.b32.xlu2 %v2286_v20, %s2193_s24 }
 0x1d1   :  { %226 = vrot.lane.b32.xlu2 %v2286_v20, %s2191_s3 }
 0x213   :  { %v213_v18 = vpop.permute.xlu2 %212 }
 0x214   :  { %v2291_v21 = vpack.i.bf16 %v213_v18, %v206_v19  ;;  %v245_v34 = vrot.slane %v213_v18, 4 }
 0x216   :  { %1969 = vrot.lane.b32.xlu2 %v2291_v21, %s2194_s25 }
 0x21b   :  { %v219_v22 = vpop.permute.xlu2 %218 }
 0x21c   :  { %v230_v26 = vrot.slane %v219_v22, 4  ;;  %v234_v29 = vsel %vm231_vm14, %v219_v22, %v233_v27 }
 0x21d   :  { %v242_v33 = vperm.slane %v234_v29, %v2297_v28 }
 0x21e   :  { %v232_v30 = vsel %vm231_vm14, %v230_v26, %v206_v19 }
 0x21f   :  { %v238_v35 = vperm.slane %v232_v30, %v2297_v28  ;;  %v269_v42 = vrot.slane %v242_v33, 4 }
 0x221   :  { %v257_v46 = vrot.slane %v238_v35, 4 }
 0x223   :  { %v2295_v25 = vpop.permute.xlu2 %220 }
 0x22b   :  { %v225_v36 = vpop.permute.xlu0 %224  ;;  %v2303_v37 = vpop.permute.xlu2 %226 }
 0x22c   :  { %v243_v39 = vrot.slane %v225_v36, 4  ;;  %v246_v40 = vsel %vm231_vm14, %v225_v36, %v245_v34  ;;  %v2308_v41 = vpack.i.bf16 %v225_v36, %v219_v22  ;;  %v2313_v44 = vpack.i.bf16 %v2303_v37, %v2295_v25 }
 0x22d   :  { %v254_v43 = vperm.slane %v246_v40, %v2297_v28 }
 0x22e   :  { %v244_v45 = vsel %vm231_vm14, %v243_v39, %v213_v18  ;;  %1974 = vrot.lane.b32.xlu0 %v2308_v41, %s2194_s25  ;;  %1984 = vrot.lane.b32.xlu1 %v2313_v44, %s2194_s25 }
 0x22f   :  { %v250_v47 = vperm.slane %v244_v45, %v2297_v28  ;;  %v267_v48 = vrot.slane %v254_v43, 4  ;;  %v270_v49 = vsel %vm231_vm14, %v254_v43, %v269_v42  ;;  %v287_v42 = vrot.slane %v2295_v25, 4 }
 0x230   :  { %v278_v50 = vperm.slane %v270_v49, %v2305_v38  ;;  %v289_v43 = vrot.slane %v2286_v20, 4 }
 0x231   :  { %v255_v51 = vrot.slane %v250_v47, 4  ;;  %v258_v52 = vsel %vm231_vm14, %v250_v47, %v257_v46  ;;  %v268_v53 = vsel %vm231_vm14, %v267_v48, %v242_v33  ;;  %v299_v46 = vrot.slane %v2303_v37, 4 }
 0x232   :  { %v266_v54 = vperm.slane %v258_v52, %v2305_v38  ;;  %v274_v55 = vperm.slane %v268_v53, %v2305_v38  ;;  %v285_v56 = vrot.slane %v278_v50, 4  ;;  %v288_v47 = vsel %vm231_vm14, %v287_v42, %v2286_v20 }
 0x233   :  { %v256_v57 = vsel %vm231_vm14, %v255_v51, %v238_v35  ;;  %v215_v58 = vpop.permute.xlu1 %214  ;;  %v290_v48 = vsel %vm231_vm14, %v2295_v25, %v289_v43  ;;  %v294_v51 = vperm.slane %v288_v47, %v2297_v28 }
 0x234   :  { %v262_v59 = vperm.slane %v256_v57, %v2305_v38  ;;  %v281_v60 = vrot.slane %v266_v54, 4  ;;  %v283_v61 = vrot.slane %v274_v55, 4  ;;  %v286_v62 = vsel %vm231_vm14, 0.0, %v285_v56 }
 0x235   :  { %v354_v63 = vsel %vm231_vm14, %v285_v56, %v274_v55  ;;  %v359_v0 = vrot.slane %v286_v62, 4  ;;  %v2334_v3 = vpack.i.bf16 %v215_v58, %v2286_v20  ;;  %v301_v45 = vrot.slane %v215_v58, 4 }
 0x236   :  { %v282_v1 = vsel %vm231_vm14, 0.0, %v281_v60  ;;  %v284_v2 = vsel %vm231_vm14, 0.0, %v283_v61  ;;  %v279_v5 = vrot.slane %v262_v59, 4  ;;  %v343_v6 = vsel %vm231_vm14, %v281_v60, %v262_v59 }
 0x237   :  { %v348_v4 = vrot.slane %v282_v1, 4  ;;  %1979 = vrot.lane.b32.xlu2 %v2334_v3, %s2194_s25  ;;  %v347_v7 = vperm.slane %v343_v6, %v2297_v28  ;;  %v358_v9 = vperm.slane %v354_v63, %v2297_v28  ;;  %v360_v11 = vsel %vm231_vm14, %v359_v0, %v284_v2 }
 0x238   :  { %v280_v8 = vsel %vm231_vm14, 0.0, %v279_v5  ;;  %v364_v15 = vperm.slane %v360_v11, %v2297_v28  ;;  %v300_v49 = vsel %vm231_vm14, %v299_v46, %v215_v58  ;;  %v302_v50 = vsel %vm231_vm14, %v2303_v37, %v301_v45 }
 0x239   :  { %v349_v12 = vsel %vm231_vm14, %v348_v4, %v280_v8  ;;  %v367_v16 = vrot.slane %v347_v7, 4  ;;  %v379_v17 = vrot.slane %v358_v9, 4  ;;  %v298_v52 = vperm.slane %v290_v48, %v2297_v28 }
 0x23a   :  { %v353_v14 = vperm.slane %v349_v12, %v2297_v28  ;;  %v377_v24 = vrot.slane %v364_v15, 4  ;;  %v306_v53 = vperm.slane %v300_v49, %v2297_v28  ;;  %v310_v54 = vperm.slane %v302_v50, %v2297_v28 }
 0x23b   :  { %v380_v13 = vsel %vm231_vm14, %v364_v15, %v379_v17  ;;  %v313_v55 = vrot.slane %v294_v51, 4  ;;  %v325_v56 = vrot.slane %v298_v52, 4 }
 0x23c   :  { %v368_v19 = vsel %vm231_vm14, %v353_v14, %v367_v16  ;;  %v388_v22 = vperm.slane %v380_v13, %v2305_v38  ;;  %v365_v23 = vrot.slane %v353_v14, 4  ;;  %v378_v30 = vsel %vm231_vm14, %v377_v24, %v358_v9 }
 0x23d   :  { %v376_v18 = vperm.slane %v368_v19, %v2305_v38  ;;  %v384_v33 = vperm.slane %v378_v30, %v2305_v38  ;;  %v311_v57 = vrot.slane %v306_v53, 4  ;;  %v314_v20 = vsel %vm231_vm14, %v306_v53, %v313_v55 }
 0x23e   :  { %v393_v26 = vrot.slane %v388_v22, 4  ;;  %v366_v29 = vsel %vm231_vm14, %v365_v23, %v347_v7  ;;  %v323_v59 = vrot.slane %v310_v54, 4  ;;  %v326_v25 = vsel %vm231_vm14, %v310_v54, %v325_v56 }
 0x23f   :  { %v395_v27 = vrot.slane %v376_v18, 4  ;;  %v372_v32 = vperm.slane %v366_v29, %v2305_v38  ;;  %v389_v35 = vrot.slane %v384_v33, 4  ;;  %v312_v58 = vsel %vm231_vm14, %v311_v57, %v294_v51 }
 0x240   :  { %v2353_v31 = vsel %vm231_vm14, %v393_v26, %v376_v18  ;;  %v322_v37 = vperm.slane %v314_v20, %v2305_v38  ;;  %v334_v60 = vperm.slane %v326_v25, %v2305_v38  ;;  %v324_v61 = vsel %vm231_vm14, %v323_v59, %v298_v52 }
 0x241   :  { %v2358_v34 = vsel %vm231_vm14, %v388_v22, %v395_v27  ;;  %v391_v36 = vrot.slane %v372_v32, 4  ;;  %v2361_v39 = vsel %vm231_vm14, %v389_v35, %v372_v32  ;;  %v318_v63 = vperm.slane %v312_v58, %v2305_v38 }
 0x242   :  { %v330_v0 = vperm.slane %v324_v61, %v2305_v38  ;;  %v337_v1 = vrot.slane %v322_v37, 4  ;;  %v341_v2 = vrot.slane %v334_v60, 4 }
 0x243   :  { %v2364_v40 = vsel %vm231_vm14, %v384_v33, %v391_v36  ;;  %v335_v4 = vrot.slane %v318_v63, 4 }
 0x244   :  { %v338_v5 = vsel %vm231_vm14, 0.0, %v337_v1  ;;  %v339_v6 = vrot.slane %v330_v0, 4  ;;  %v342_v7 = vsel %vm231_vm14, 0.0, %v341_v2  ;;  %v397_v11 = vsel %vm231_vm14, %v337_v1, %v318_v63 }
 0x245   :  { %v336_v9 = vsel %vm231_vm14, 0.0, %v335_v4  ;;  %v402_v12 = vrot.slane %v338_v5, 4  ;;  %v413_v14 = vrot.slane %v342_v7, 4  ;;  %v408_v16 = vsel %vm231_vm14, %v341_v2, %v330_v0 }
 0x246   :  { %v340_v15 = vsel %vm231_vm14, 0.0, %v339_v6  ;;  %v2395_v22 = vperm.slane %v397_v11, %v2297_v28  ;;  %v2401_v26 = vperm.slane %v408_v16, %v2297_v28 }
 0x247   :  { %v2398_v24 = vsel %vm231_vm14, %v402_v12, %v336_v9  ;;  %v2404_v27 = vsel %vm231_vm14, %v413_v14, %v340_v15 }
 0x270   :  { %v1970_v62 = vpop.permute.xlu2 %1969 }
 0x271   :  { %v1972_v17 = vunpack.i.h.bf16 %v1970_v62  ;;  %v1971_v19 = vunpack.i.l.bf16 %v1970_v62 }
 0x273   :  { %v489_v29 = vrot.slane %v1972_v17, 4  ;;  %v477_v30 = vrot.slane %v1971_v19, 4 }
 0x291   :  { %v1980_v8 = vpop.permute.xlu2 %1979 }
 0x292   :  { %v1982_v13 = vunpack.i.h.bf16 %v1980_v8  ;;  %v1981_v18 = vunpack.i.l.bf16 %v1980_v8 }
 0x294   :  { %v545_v36 = vrot.slane %v1982_v13, 4  ;;  %v533_v42 = vrot.slane %v1981_v18, 4 }
 0x2a0   :  { %v1975_v23 = vpop.permute.xlu0 %1974  ;;  %v1985_v35 = vpop.permute.xlu1 %1984 }
 0x2a1   :  { %v1977_v32 = vunpack.i.h.bf16 %v1975_v23  ;;  %v1976_v33 = vunpack.i.l.bf16 %v1975_v23  ;;  %v1987_v43 = vunpack.i.h.bf16 %v1985_v35  ;;  %v1986_v45 = vunpack.i.l.bf16 %v1985_v35 }
 0x2a3   :  { %v487_v46 = vrot.slane %v1977_v32, 4  ;;  %v475_v47 = vrot.slane %v1976_v33, 4  ;;  %v478_v48 = vsel %vm231_vm14, %v1976_v33, %v477_v30  ;;  %v490_v49 = vsel %vm231_vm14, %v1977_v32, %v489_v29 }
 0x2a4   :  { %v486_v50 = vperm.slane %v478_v48, %v2297_v28  ;;  %v498_v51 = vperm.slane %v490_v49, %v2297_v28  ;;  %v543_v52 = vrot.slane %v1987_v43, 4  ;;  %v531_v53 = vrot.slane %v1986_v45, 4 }
 0x2a5   :  { %v476_v54 = vsel %vm231_vm14, %v475_v47, %v1971_v19  ;;  %v488_v55 = vsel %vm231_vm14, %v487_v46, %v1972_v17  ;;  %v534_v56 = vsel %vm231_vm14, %v1986_v45, %v533_v42  ;;  %v546_v57 = vsel %vm231_vm14, %v1987_v43, %v545_v36 }
 0x2a6   :  { %v482_v20 = vperm.slane %v476_v54, %v2297_v28  ;;  %v494_v59 = vperm.slane %v488_v55, %v2297_v28  ;;  %v511_v25 = vrot.slane %v498_v51, 4  ;;  %v513_v58 = vrot.slane %v486_v50, 4 }
 0x2a7   :  { %v532_v37 = vsel %vm231_vm14, %v531_v53, %v1981_v18  ;;  %v542_v60 = vperm.slane %v534_v56, %v2297_v28  ;;  %v544_v61 = vsel %vm231_vm14, %v543_v52, %v1982_v13  ;;  %v554_v62 = vperm.slane %v546_v57, %v2297_v28 }
 0x2a8   :  { %v499_v63 = vrot.slane %v494_v59, 4  ;;  %v501_v0 = vrot.slane %v482_v20, 4  ;;  %v512_v1 = vsel %vm231_vm14, %v511_v25, %v486_v50  ;;  %v514_v2 = vsel %vm231_vm14, %v498_v51, %v513_v58 }
 0x2a9   :  { %v518_v4 = vperm.slane %v512_v1, %v2305_v38  ;;  %v522_v5 = vperm.slane %v514_v2, %v2305_v38  ;;  %v538_v6 = vperm.slane %v532_v37, %v2297_v28  ;;  %v550_v7 = vperm.slane %v544_v61, %v2297_v28 }
 0x2aa   :  { %v500_v8 = vsel %vm231_vm14, %v499_v63, %v482_v20  ;;  %v502_v9 = vsel %vm231_vm14, %v494_v59, %v501_v0  ;;  %v567_v11 = vrot.slane %v554_v62, 4  ;;  %v569_v12 = vrot.slane %v542_v60, 4 }
 0x2ab   :  { %v506_v14 = vperm.slane %v500_v8, %v2305_v38  ;;  %v510_v15 = vperm.slane %v502_v9, %v2305_v38  ;;  %v527_v16 = vrot.slane %v518_v4, 4  ;;  %v529_v17 = vrot.slane %v522_v5, 4 }
 0x2ac   :  { %v555_v19 = vrot.slane %v550_v7, 4  ;;  %v557_v13 = vrot.slane %v538_v6, 4  ;;  %v568_v18 = vsel %vm231_vm14, %v567_v11, %v542_v60  ;;  %v570_v23 = vsel %vm231_vm14, %v554_v62, %v569_v12 }
 0x2ad   :  { %v523_v29 = vrot.slane %v506_v14, 4  ;;  %v525_v30 = vrot.slane %v510_v15, 4  ;;  %v528_v32 = vsel %vm231_vm14, 0.0, %v527_v16  ;;  %v530_v33 = vsel %vm231_vm14, 0.0, %v529_v17 }
 0x2ae   :  { %v603_v35 = vrot.slane %v530_v33, 4  ;;  %v556_v36 = vsel %vm231_vm14, %v555_v19, %v538_v6  ;;  %v558_v42 = vsel %vm231_vm14, %v550_v7, %v557_v13  ;;  %v574_v43 = vperm.slane %v568_v18, %v2305_v38 }
 0x2af   :  { %v526_v45 = vsel %vm231_vm14, 0.0, %v525_v30  ;;  %v562_v46 = vperm.slane %v556_v36, %v2305_v38  ;;  %v566_v47 = vperm.slane %v558_v42, %v2305_v38  ;;  %v578_v48 = vperm.slane %v570_v23, %v2305_v38 }
 0x2b0   :  { %v583_v49 = vrot.slane %v574_v43, 4  ;;  %v524_v50 = vsel %vm231_vm14, 0.0, %v523_v29  ;;  %v587_v51 = vsel %vm231_vm14, %v525_v30, %v506_v14  ;;  %v592_v52 = vrot.slane %v526_v45, 4 }
 0x2b1   :  { %v579_v53 = vrot.slane %v562_v46, 4  ;;  %v581_v54 = vrot.slane %v566_v47, 4  ;;  %v585_v55 = vrot.slane %v578_v48, 4  ;;  %v591_v56 = vperm.slane %v587_v51, %v2297_v28 }
 0x2b2   :  { %v584_v57 = vsel %vm231_vm14, 0.0, %v583_v49  ;;  %v593_v20 = vsel %vm231_vm14, %v592_v52, %v524_v50  ;;  %v598_v59 = vsel %vm231_vm14, %v529_v17, %v518_v4  ;;  %v604_v25 = vsel %vm231_vm14, %v603_v35, %v528_v32 }
 0x2b3   :  { %v582_v58 = vsel %vm231_vm14, 0.0, %v581_v54  ;;  %v586_v37 = vsel %vm231_vm14, 0.0, %v585_v55  ;;  %v652_v60 = vsel %vm231_vm14, %v585_v55, %v574_v43  ;;  %v597_v61 = vperm.slane %v593_v20, %v2297_v28 }
 0x2b4   :  { %v646_v62 = vrot.slane %v582_v58, 4  ;;  %v657_v63 = vrot.slane %v586_v37, 4  ;;  %v602_v0 = vperm.slane %v598_v59, %v2297_v28  ;;  %v608_v1 = vperm.slane %v604_v25, %v2297_v28 }
 0x2b5   :  { %v611_v2 = vrot.slane %v591_v56, 4  ;;  %v580_v4 = vsel %vm231_vm14, 0.0, %v579_v53  ;;  %v641_v5 = vsel %vm231_vm14, %v581_v54, %v562_v46  ;;  %v656_v6 = vperm.slane %v652_v60, %v2297_v28 }
 0x2b6   :  { %v623_v7 = vrot.slane %v602_v0, 4  ;;  %v645_v8 = vperm.slane %v641_v5, %v2297_v28  ;;  %v647_v9 = vsel %vm231_vm14, %v646_v62, %v580_v4  ;;  %v658_v11 = vsel %vm231_vm14, %v657_v63, %v584_v57 }
 0x2b7   :  { %v612_v12 = vsel %vm231_vm14, %v597_v61, %v611_v2  ;;  %v651_v14 = vperm.slane %v647_v9, %v2297_v28  ;;  %v662_v15 = vperm.slane %v658_v11, %v2297_v28  ;;  %v677_v16 = vrot.slane %v656_v6, 4 }
 0x2b8   :  { %v620_v17 = vperm.slane %v612_v12, %v2305_v38  ;;  %v624_v19 = vsel %vm231_vm14, %v608_v1, %v623_v7  ;;  %v665_v13 = vrot.slane %v645_v8, 4  ;;  %v609_v18 = vrot.slane %v597_v61, 4 }
 0x2b9   :  { %v632_v23 = vperm.slane %v624_v19, %v2305_v38  ;;  %v678_v29 = vsel %vm231_vm14, %v662_v15, %v677_v16  ;;  %v621_v30 = vrot.slane %v608_v1, 4  ;;  %v663_v32 = vrot.slane %v651_v14, 4 }
 0x2ba   :  { %v666_v33 = vsel %vm231_vm14, %v651_v14, %v665_v13  ;;  %v686_v35 = vperm.slane %v678_v29, %v2305_v38  ;;  %v610_v36 = vsel %vm231_vm14, %v609_v18, %v591_v56  ;;  %v639_v42 = vrot.slane %v620_v17, 4 }
 0x2bb   :  { %v637_v43 = vrot.slane %v632_v23, 4  ;;  %v674_v45 = vperm.slane %v666_v33, %v2305_v38  ;;  %v616_v46 = vperm.slane %v610_v36, %v2305_v38  ;;  %v622_v47 = vsel %vm231_vm14, %v621_v30, %v602_v0 }
 0x2bc   :  { %v691_v48 = vrot.slane %v686_v35, 4  ;;  %v628_v49 = vperm.slane %v622_v47, %v2305_v38  ;;  %v640_v50 = vsel %vm231_vm14, %v632_v23, %v639_v42  ;;  %v664_v51 = vsel %vm231_vm14, %v663_v32, %v645_v8 }
 0x2bd   :  { %v638_v52 = vsel %vm231_vm14, %v637_v43, %v620_v17  ;;  %v693_v53 = vrot.slane %v674_v45, 4  ;;  %v950_v54 = vpack.c.bf16 %v640_v50, %v640_v50  ;;  %v670_v55 = vperm.slane %v664_v51, %v2305_v38 }
 0x2be   :  { %v949_v56 = vpack.c.bf16 %v638_v52, %v638_v52  ;;  %v692_v57 = vsel %vm231_vm14, %v691_v48, %v674_v45  ;;  %v633_v20 = vrot.slane %v628_v49, 4  ;;  %v675_v59 = vrot.slane %v662_v15, 4 }
 0x2bf   :  { %v953_v25 = vpack.c.bf16 %v692_v57, %v692_v57  ;;  %v1017_v58 = vsel %vm955_vm15, %v950_v54, 0  ;;  %v694_v37 = vsel %vm231_vm14, %v686_v35, %v693_v53  ;;  %v635_v60 = vrot.slane %v616_v46, 4  ;;  %v1948_v57 = vld [vmem:[#allocation2] sm:$0xff]  }
 0x2c0   :  { %v998_v61 = vsel %vm955_vm15, %v949_v56, 0  ;;  %v634_v62 = vsel %vm231_vm14, %v633_v20, %v616_v46  ;;  %1026 = vmatpush.bf16.xpose.msrb.mxu0 %v1017_v58  ;;  %v676_v63 = vsel %vm231_vm14, %v675_v59, %v656_v6  ;;  %v954_v0 = vpack.c.bf16 %v694_v37, %v694_v37 }
 0x2c1   :  { %1007 = vmatpush.bf16.xpose.msra.mxu3 %v998_v61  ;;  %v1074_v1 = vsel %vm955_vm15, %v953_v25, 0  ;;  %v947_v2 = vpack.c.bf16 %v634_v62, %v634_v62  ;;  %v682_v4 = vperm.slane %v676_v63, %v2305_v38  ;;  %v636_v5 = vsel %vm231_vm14, %v628_v49, %v635_v60 }
 0x2c2   :  { %v1093_v7 = vsel %vm955_vm15, %v954_v0, 0  ;;  %v948_v8 = vpack.c.bf16 %v636_v5, %v636_v5  ;;  %v689_v9 = vrot.slane %v670_v55, 4  ;;  %v407_v11 = vperm.slane %v2398_v24, %v2297_v28 }
 0x2c3   :  { %v960_v12 = vsel %vm955_vm15, %v947_v2, 0  ;;  %v687_v6 = vrot.slane %v682_v4, 4  ;;  %v418_v14 = vperm.slane %v2404_v27, %v2297_v28  ;;  %v421_v15 = vrot.slane %v2395_v22, 4 }
 0x2c4   :  { %969 = vmatpush.bf16.xpose.msra.mxu1 %v960_v12  ;;  %v979_v16 = vsel %vm955_vm15, %v948_v8, 0  ;;  %v690_v17 = vsel %vm231_vm14, %v682_v4, %v689_v9  ;;  %v433_v19 = vrot.slane %v2401_v26, 4  ;;  %v942_v18 = vpack.c.bf16 %v2358_v34, %v2358_v34 }
 0x2c5   :  { %v688_v13 = vsel %vm231_vm14, %v687_v6, %v670_v55  ;;  %988 = vmatpush.bf16.xpose.msra.mxu2 %v979_v16  ;;  %v952_v24 = vpack.c.bf16 %v690_v17, %v690_v17  ;;  %v941_v27 = vpack.c.bf16 %v2353_v31, %v2353_v31  ;;  %v422_v30 = vsel %vm231_vm14, %v407_v11, %v421_v15 }
 0x2c6   :  { %v951_v23 = vpack.c.bf16 %v688_v13, %v688_v13  ;;  %v431_v32 = vrot.slane %v418_v14, 4  ;;  %v434_v35 = vsel %vm231_vm14, %v418_v14, %v433_v19  ;;  %v419_v36 = vrot.slane %v407_v11, 4 }
 0x2c7   :  { %v1055_v29 = vsel %vm955_vm15, %v952_v24, 0  ;;  %1889 = vmatmul.msk.bf16.vlgmr.msrb.gmra.mxu0 %vm955_vm15, %v942_v18  ;;  %v939_v34 = vpack.c.bf16 %v2361_v39, %v2361_v39  ;;  %v940_v31 = vpack.c.bf16 %v2364_v40, %v2364_v40  ;;  %v430_v42 = vperm.slane %v422_v30, %v2305_v38 }
 0x2c8   :  { %1102 = vmatpush.bf16.xpose.msra.mxu0 %v1093_v7  ;;  %v1036_v33 = vsel %vm955_vm15, %v951_v23, 0  ;;  %1888 = vmatmul.msk.bf16.vlgmr.msra.gmra.mxu3 %vm955_vm15, %v941_v27  ;;  %v442_v43 = vperm.slane %v434_v35, %v2305_v38  ;;  %v432_v45 = vsel %vm231_vm14, %v431_v32, %v2401_v26  ;;  %v420_v46 = vsel %vm231_vm14, %v419_v36, %v2395_v22 }
 0x2c9   :  { %1083 = vmatpush.bf16.xpose.msrb.mxu3 %v1074_v1  ;;  %v449_v47 = vrot.slane %v430_v42, 4  ;;  %v438_v39 = vperm.slane %v432_v45, %v2305_v38  ;;  %v426_v40 = vperm.slane %v420_v46, %v2305_v38  ;;  %v1949_v20 = vunpack.c.l.bf16 %v1948_v57 }
 0x2ca   :  { %v447_v48 = vrot.slane %v442_v43, 4  ;;  %v1950_v12 = vunpack.c.h.bf16 %v1948_v57 }
 0x2cb   :  { %1886 = vmatmul.msk.bf16.vlgmr.msra.gmra.mxu1 %vm955_vm15, %v939_v34  ;;  %v443_v49 = vrot.slane %v438_v39, 4  ;;  %v450_v50 = vsel %vm231_vm14, %v442_v43, %v449_v47  ;;  %v445_v52 = vrot.slane %v426_v40, 4  ;;  %vm2530_vm1 = vcmp.eq.f32.partialorder %v1949_v20, 0.0 }
 0x2cc   :  { %1045 = vmatpush.bf16.xpose.msrb.mxu1 %v1036_v33  ;;  %1887 = vmatmul.msk.bf16.vlgmr.msra.gmra.mxu2 %vm955_vm15, %v940_v31  ;;  %v448_v51 = vsel %vm231_vm14, %v447_v48, %v430_v42  ;;  %v946_v53 = vpack.c.bf16 %v450_v50, %v450_v50  ;;  %vm2549_vm2 = vcmp.eq.f32.partialorder %v1950_v12, 0.0 }
 0x2cd   :  { %1064 = vmatpush.bf16.xpose.msrb.mxu2 %v1055_v29  ;;  %v945_v54 = vpack.c.bf16 %v448_v51, %v448_v51  ;;  %v444_v26 = vsel %vm231_vm14, %v443_v49, %v426_v40  ;;  %v446_v22 = vsel %vm231_vm14, %v438_v39, %v445_v52 }
 0x2ce   :  { %v943_v55 = vpack.c.bf16 %v444_v26, %v444_v26  ;;  %v944_v56 = vpack.c.bf16 %v446_v22, %v446_v22 }
 0x2d7   :  { %1893 = vmatmul.msk.bf16.vlgmr.msra.gmra.mxu0 %vm955_vm15, %v946_v53 }
 0x2d8   :  { %1892 = vmatmul.msk.bf16.vlgmr.msrb.gmra.mxu3 %vm955_vm15, %v945_v54 }
 0x2db   :  { %1890 = vmatmul.msk.bf16.vlgmr.msrb.gmra.mxu1 %vm955_vm15, %v943_v55 }
 0x2dc   :  { %1891 = vmatmul.msk.bf16.vlgmr.msrb.gmra.mxu2 %vm955_vm15, %v944_v56 }
 0x344   :  { %v1028_v59 = vpop.f32.mrf.mxu0 }
 0x345   :  { %v1111_v58 = vmul.f32 0.35355338, %v1028_v59 }
 0x347   :  { %v2536_v37 = vsel %vm2530_vm1, -1e+09, %v1111_v58 }
 0x348   :  { %v971_v60 = vpop.f32.mrf.mxu1  ;;  %v1143_v61 = vsel %vm955_vm15, %v2536_v37, -inf }
 0x349   :  { %v1108_v62 = vmul.f32 0.35355338, %v971_v60  ;;  %1144 = vmax.xlane.f32.xlu0 %v1143_v61 }
 0x34b   :  { %v1009_v63 = vpop.f32.mrf.mxu3  ;;  %v1126_v0 = vsel %vm2530_vm1, -1e+09, %v1108_v62 }
 0x34c   :  { %v1110_v1 = vmul.f32 0.35355338, %v1009_v63  ;;  %v1134_v2 = vsel %vm955_vm15, %v1126_v0, -inf  ;;  %v1030_v4 = vpop.f32.mrf.mxu0 }
 0x34d   :  { %1135 = vmax.xlane.f32.xlu1 %v1134_v2 }
 0x34e   :  { %v1128_v5 = vsel %vm2530_vm1, -1e+09, %v1110_v1 }
 0x34f   :  { %v990_v7 = vpop.f32.mrf.mxu2  ;;  %v1140_v11 = vsel %vm955_vm15, %v1128_v5, -inf }
 0x350   :  { %v973_v8 = vpop.f32.mrf.mxu1  ;;  %v1109_v9 = vmul.f32 0.35355338, %v990_v7 }
 0x351   :  { %1141 = vmax.xlane.f32.xlu0 %v1140_v11 }
 0x352   :  { %v1127_v6 = vsel %vm2530_vm1, -1e+09, %v1109_v9 }
 0x353   :  { %v1011_v14 = vpop.f32.mrf.mxu3  ;;  %v1137_v15 = vsel %vm955_vm15, %v1127_v6, -inf }
 0x354   :  { %1138 = vmax.xlane.f32.xlu2 %v1137_v15  ;;  %v1104_v16 = vpop.f32.mrf.mxu0 }
 0x355   :  { %v1115_v19 = vmul.f32 0.35355338, %v1104_v16 }
 0x357   :  { %v992_v13 = vpop.f32.mrf.mxu2  ;;  %v2555_v24 = vsel %vm2549_vm2, -1e+09, %v1115_v19 }
 0x358   :  { %v1047_v18 = vpop.f32.mrf.mxu1  ;;  %v1155_v27 = vsel %vm955_vm15, %v2555_v24, -inf }
 0x359   :  { %v1112_v23 = vmul.f32 0.35355338, %v1047_v18 }
 0x35b   :  { %v1085_v29 = vpop.f32.mrf.mxu3  ;;  %v1130_v30 = vsel %vm2549_vm2, -1e+09, %v1112_v23 }
 0x35c   :  { %v1114_v32 = vmul.f32 0.35355338, %v1085_v29  ;;  %1156 = vmax.xlane.f32.xlu2 %v1155_v27  ;;  %v1146_v33 = vsel %vm955_vm15, %v1130_v30, -inf  ;;  %v1106_v35 = vpop.f32.mrf.mxu0 }
 0x35d   :  { %1147 = vmax.xlane.f32.xlu0 %v1146_v33 }
 0x35e   :  { %v1132_v42 = vsel %vm2549_vm2, -1e+09, %v1114_v32 }
 0x35f   :  { %v1066_v36 = vpop.f32.mrf.mxu2  ;;  %v1152_v46 = vsel %vm955_vm15, %v1132_v42, -inf }
 0x360   :  { %v1049_v34 = vpop.f32.mrf.mxu1  ;;  %v1113_v31 = vmul.f32 0.35355338, %v1066_v36 }
 0x362   :  { %v1131_v43 = vsel %vm2549_vm2, -1e+09, %v1113_v31 }
 0x363   :  { %v1087_v45 = vpop.f32.mrf.mxu3  ;;  %v1149_v47 = vsel %vm955_vm15, %v1131_v43, -inf }
 0x364   :  { %1153 = vmax.xlane.f32.xlu2 %v1152_v46  ;;  %1150 = vmax.xlane.f32.xlu1 %v1149_v47 }
 0x367   :  { %v1068_v39 = vpop.f32.mrf.mxu2 }
 0x371   :  { %1994 = vrot.lane.b32.xlu0 %v2308_v41, %s2187_s11 }
 0x379   :  { %2004 = vrot.lane.b32.xlu0 %v2313_v44, %s2187_s11 }
 0x37c   :  { %1999 = vrot.lane.b32.xlu2 %v2334_v3, %s2187_s11 }
 0x37d   :  { %1989 = vrot.lane.b32.xlu1 %v2291_v21, %s2187_s11 }
 0x3bc   :  { %v1145_v48 = vpop.xlane.xlu0 %1144 }
 0x3bd   :  { %v1161_v53 = vsub.f32 %v2536_v37, %v1145_v48 }
 0x3bf   :  { %v1172_v3 = vmul.f32 1.442695, %v1161_v53 }
 0x3c0   :  { %v1136_v40 = vpop.xlane.xlu1 %1135 }
 0x3c1   :  { %v1158_v49 = vsub.f32 %v1126_v0, %v1136_v40 }
 0x3c3   :  { %v1166_v50 = vmul.f32 1.442695, %v1158_v49 }
 0x3c4   :  { %v1142_v51 = vpop.xlane.xlu0 %1141 }
 0x3c5   :  { %2041 = vpow2.f32 %v1166_v50  ;;  %v1160_v52 = vsub.f32 %v1128_v5, %v1142_v51 }
 0x3c7   :  { %v1170_v54 = vmul.f32 1.442695, %v1160_v52  ;;  %v1139_v41 = vpop.xlane.xlu2 %1138 }
 0x3c8   :  { %v1159_v26 = vsub.f32 %v1127_v6, %v1139_v41 }
 0x3c9   :  { %2043 = vpow2.f32 %v1170_v54 }
 0x3ca   :  { %v1168_v44 = vmul.f32 1.442695, %v1159_v26 }
 0x3cb   :  { %v2577_v22 = vpop.eup %2041 }
 0x3cc   :  { %2045 = vpow2.f32 %v1168_v44  ;;  %v1182_v21 = vsel %vm955_vm15, %v2577_v22, 0.0 }
 0x3cd   :  { %1183 = vadd.xlane.f32.xlu0 %v1182_v21  ;;  %2047 = vpow2.f32 %v1172_v3 }
 0x3cf   :  { %v2581_v55 = vpop.eup %2043  ;;  %v1157_v56 = vpop.xlane.xlu2 %1156 }
 0x3d0   :  { %v1148_v57 = vpop.xlane.xlu0 %1147  ;;  %v1188_v20 = vsel %vm955_vm15, %v2581_v55, 0.0  ;;  %v1165_v2 = vsub.f32 %v2555_v24, %v1157_v56 }
 0x3d1   :  { %v1162_v59 = vsub.f32 %v1130_v30, %v1148_v57  ;;  %1189 = vadd.xlane.f32.xlu1 %v1188_v20 }
 0x3d2   :  { %v2585_v25 = vpop.eup %2045  ;;  %v1180_v8 = vmul.f32 1.442695, %v1165_v2 }
 0x3d3   :  { %v1174_v58 = vmul.f32 1.442695, %v1162_v59  ;;  %v1185_v37 = vsel %vm955_vm15, %v2585_v25, 0.0  ;;  %v2589_v60 = vpop.eup %2047 }
 0x3d4   :  { %1186 = vadd.xlane.f32.xlu2 %v1185_v37  ;;  %v1191_v1 = vsel %vm955_vm15, %v2589_v60, 0.0 }
 0x3d5   :  { %2049 = vpow2.f32 %v1174_v58 }
 0x3d7   :  { %v1154_v61 = vpop.xlane.xlu2 %1153  ;;  %v1151_v62 = vpop.xlane.xlu1 %1150 }
 0x3d8   :  { %v1164_v63 = vsub.f32 %v1132_v42, %v1154_v61  ;;  %v1163_v0 = vsub.f32 %v1131_v43, %v1151_v62 }
 0x3d9   :  { %1192 = vadd.xlane.f32.xlu1 %v1191_v1 }
 0x3da   :  { %v1178_v4 = vmul.f32 1.442695, %v1164_v63  ;;  %v1176_v5 = vmul.f32 1.442695, %v1163_v0 }
 0x3db   :  { %v2594_v7 = vpop.eup %2049 }
 0x3dc   :  { %2051 = vpow2.f32 %v1178_v4  ;;  %v1194_v9 = vsel %vm955_vm15, %v2594_v7, 0.0 }
 0x3dd   :  { %2053 = vpow2.f32 %v1176_v5 }
 0x3de   :  { %2055 = vpow2.f32 %v1180_v8 }
 0x3df   :  { %v2000_v16 = vpop.permute.xlu2 %1999 }
 0x3e0   :  { %v2002_v19 = vunpack.i.h.bf16 %v2000_v16  ;;  %v2001_v13 = vunpack.i.l.bf16 %v2000_v16 }
 0x3e1   :  { %1195 = vadd.xlane.f32.xlu1 %v1194_v9 }
 0x3e2   :  { %v2598_v11 = vpop.eup %2051  ;;  %v789_v29 = vrot.slane %v2002_v19, 4  ;;  %v777_v30 = vrot.slane %v2001_v13, 4 }
 0x3e3   :  { %v2600_v12 = vpop.eup %2053  ;;  %v1995_v6 = vpop.permute.xlu0 %1994  ;;  %v1200_v14 = vsel %vm955_vm15, %v2598_v11, 0.0 }
 0x3e4   :  { %1201 = vadd.xlane.f32.xlu2 %v1200_v14  ;;  %v1197_v15 = vsel %vm955_vm15, %v2600_v12, 0.0  ;;  %v2606_v17 = vpop.eup %2055  ;;  %v1997_v24 = vunpack.i.h.bf16 %v1995_v6  ;;  %v1996_v18 = vunpack.i.l.bf16 %v1995_v6 }
 0x3e5   :  { %1198 = vadd.xlane.f32.xlu0 %v1197_v15  ;;  %v1203_v27 = vsel %vm955_vm15, %v2606_v17, 0.0 }
 0x3e6   :  { %v731_v42 = vrot.slane %v1997_v24, 4  ;;  %v719_v43 = vrot.slane %v1996_v18, 4 }
 0x3eb   :  { %v2005_v23 = vpop.permute.xlu0 %2004 }
 0x3ec   :  { %v2007_v32 = vunpack.i.h.bf16 %v2005_v23  ;;  %v2006_v33 = vunpack.i.l.bf16 %v2005_v23  ;;  %1204 = vadd.xlane.f32.xlu2 %v1203_v27 }
 0x3ee   :  { %v787_v35 = vrot.slane %v2007_v32, 4  ;;  %v790_v36 = vsel %vm231_vm14, %v2007_v32, %v789_v29  ;;  %v775_v34 = vrot.slane %v2006_v33, 4  ;;  %v778_v31 = vsel %vm231_vm14, %v2006_v33, %v777_v30 }
 0x3ef   :  { %v798_v45 = vperm.slane %v790_v36, %v2297_v28  ;;  %v786_v46 = vperm.slane %v778_v31, %v2297_v28  ;;  %v1990_v47 = vpop.permute.xlu1 %1989 }
 0x3f0   :  { %v788_v39 = vsel %vm231_vm14, %v787_v35, %v2002_v19  ;;  %v776_v48 = vsel %vm231_vm14, %v775_v34, %v2001_v13  ;;  %v1992_v40 = vunpack.i.h.bf16 %v1990_v47  ;;  %v1991_v49 = vunpack.i.l.bf16 %v1990_v47 }
 0x3f1   :  { %v794_v50 = vperm.slane %v788_v39, %v2297_v28  ;;  %v811_v51 = vrot.slane %v798_v45, 4  ;;  %v782_v52 = vperm.slane %v776_v48, %v2297_v28  ;;  %v813_v53 = vrot.slane %v786_v46, 4 }
 0x3f2   :  { %v733_v54 = vrot.slane %v1992_v40, 4  ;;  %v720_v41 = vsel %vm231_vm14, %v719_v43, %v1991_v49  ;;  %v721_v26 = vrot.slane %v1991_v49, 4  ;;  %v732_v44 = vsel %vm231_vm14, %v731_v42, %v1992_v40 }
 0x3f3   :  { %v799_v3 = vrot.slane %v794_v50, 4  ;;  %v801_v21 = vrot.slane %v782_v52, 4  ;;  %v812_v56 = vsel %vm231_vm14, %v811_v51, %v786_v46  ;;  %v814_v57 = vsel %vm231_vm14, %v798_v45, %v813_v53 }
 0x3f4   :  { %v818_v20 = vperm.slane %v812_v56, %v2305_v38  ;;  %v822_v59 = vperm.slane %v814_v57, %v2305_v38  ;;  %v722_v58 = vsel %vm231_vm14, %v1996_v18, %v721_v26  ;;  %v726_v37 = vperm.slane %v720_v41, %v2297_v28 }
 0x3f5   :  { %v800_v61 = vsel %vm231_vm14, %v799_v3, %v782_v52  ;;  %v802_v62 = vsel %vm231_vm14, %v794_v50, %v801_v21  ;;  %v730_v63 = vperm.slane %v722_v58, %v2297_v28  ;;  %v734_v0 = vsel %vm231_vm14, %v1997_v24, %v733_v54 }
 0x3f6   :  { %v806_v1 = vperm.slane %v800_v61, %v2305_v38  ;;  %v810_v2 = vperm.slane %v802_v62, %v2305_v38  ;;  %v827_v4 = vrot.slane %v818_v20, 4  ;;  %v829_v5 = vrot.slane %v822_v59, 4 }
 0x3f7   :  { %v738_v8 = vperm.slane %v732_v44, %v2297_v28  ;;  %v742_v9 = vperm.slane %v734_v0, %v2297_v28  ;;  %v745_v6 = vrot.slane %v726_v37, 4  ;;  %v757_v14 = vrot.slane %v730_v63, 4 }
 0x3f8   :  { %v823_v15 = vrot.slane %v806_v1, 4  ;;  %v825_v16 = vrot.slane %v810_v2, 4  ;;  %v828_v19 = vsel %vm231_vm14, 0.0, %v827_v4  ;;  %v830_v13 = vsel %vm231_vm14, 0.0, %v829_v5 }
 0x3f9   :  { %v896_v24 = vsel %vm231_vm14, %v829_v5, %v818_v20  ;;  %v901_v18 = vrot.slane %v830_v13, 4  ;;  %v743_v23 = vrot.slane %v738_v8, 4  ;;  %v746_v27 = vsel %vm231_vm14, %v738_v8, %v745_v6 }
 0x3fa   :  { %v824_v29 = vsel %vm231_vm14, 0.0, %v823_v15  ;;  %v826_v30 = vsel %vm231_vm14, 0.0, %v825_v16  ;;  %v885_v32 = vsel %vm231_vm14, %v825_v16, %v806_v1  ;;  %v754_v33 = vperm.slane %v746_v27, %v2305_v38 }
 0x3fb   :  { %v890_v35 = vrot.slane %v826_v30, 4  ;;  %v744_v36 = vsel %vm231_vm14, %v743_v23, %v726_v37  ;;  %v755_v34 = vrot.slane %v742_v9, 4  ;;  %v758_v31 = vsel %vm231_vm14, %v742_v9, %v757_v14 }
 0x3fc   :  { %v750_v42 = vperm.slane %v744_v36, %v2305_v38  ;;  %v766_v43 = vperm.slane %v758_v31, %v2305_v38  ;;  %v769_v45 = vrot.slane %v754_v33, 4  ;;  %v889_v46 = vperm.slane %v885_v32, %v2297_v28 }
 0x3fd   :  { %v756_v47 = vsel %vm231_vm14, %v755_v34, %v730_v63  ;;  %v891_v39 = vsel %vm231_vm14, %v890_v35, %v824_v29  ;;  %v900_v48 = vperm.slane %v896_v24, %v2297_v28  ;;  %v902_v40 = vsel %vm231_vm14, %v901_v18, %v828_v19 }
 0x3fe   :  { %v762_v49 = vperm.slane %v756_v47, %v2305_v38  ;;  %v767_v50 = vrot.slane %v750_v42, 4  ;;  %v770_v51 = vsel %vm231_vm14, 0.0, %v769_v45  ;;  %v773_v52 = vrot.slane %v766_v43, 4 }
 0x3ff   :  { %v831_v53 = vsel %vm231_vm14, %v769_v45, %v750_v42  ;;  %v836_v54 = vrot.slane %v770_v51, 4  ;;  %v895_v41 = vperm.slane %v891_v39, %v2297_v28  ;;  %v906_v26 = vperm.slane %v902_v40, %v2297_v28 }
 0x400   :  { %v768_v44 = vsel %vm231_vm14, 0.0, %v767_v50  ;;  %v771_v3 = vrot.slane %v762_v49, 4  ;;  %v774_v21 = vsel %vm231_vm14, 0.0, %v773_v52  ;;  %v835_v56 = vperm.slane %v831_v53, %v2297_v28 }
 0x401   :  { %v847_v57 = vrot.slane %v774_v21, 4  ;;  %v837_v20 = vsel %vm231_vm14, %v836_v54, %v768_v44  ;;  %v842_v59 = vsel %vm231_vm14, %v773_v52, %v762_v49  ;;  %v909_v58 = vrot.slane %v889_v46, 4 }
 0x402   :  { %v772_v37 = vsel %vm231_vm14, 0.0, %v771_v3  ;;  %v841_v61 = vperm.slane %v837_v20, %v2297_v28  ;;  %v846_v62 = vperm.slane %v842_v59, %v2297_v28  ;;  %v855_v63 = vrot.slane %v835_v56, 4 }
 0x403   :  { %v848_v0 = vsel %vm231_vm14, %v847_v57, %v772_v37  ;;  %v910_v1 = vsel %vm231_vm14, %v895_v41, %v909_v58  ;;  %v921_v2 = vrot.slane %v900_v48, 4  ;;  %v907_v4 = vrot.slane %v895_v41, 4 }
 0x404   :  { %v852_v5 = vperm.slane %v848_v0, %v2297_v28  ;;  %v856_v8 = vsel %vm231_vm14, %v841_v61, %v855_v63  ;;  %v867_v9 = vrot.slane %v846_v62, 4  ;;  %v918_v6 = vperm.slane %v910_v1, %v2305_v38 }
 0x405   :  { %v864_v14 = vperm.slane %v856_v8, %v2305_v38  ;;  %v922_v15 = vsel %vm231_vm14, %v906_v26, %v921_v2  ;;  %v853_v16 = vrot.slane %v841_v61, 4  ;;  %v908_v19 = vsel %vm231_vm14, %v907_v4, %v889_v46 }
 0x406   :  { %v868_v13 = vsel %vm231_vm14, %v852_v5, %v867_v9  ;;  %v930_v24 = vperm.slane %v922_v15, %v2305_v38  ;;  %v937_v18 = vrot.slane %v918_v6, 4  ;;  %v865_v23 = vrot.slane %v852_v5, 4 }
 0x407   :  { %v876_v27 = vperm.slane %v868_v13, %v2305_v38  ;;  %v883_v29 = vrot.slane %v864_v14, 4  ;;  %v854_v30 = vsel %vm231_vm14, %v853_v16, %v835_v56  ;;  %v914_v32 = vperm.slane %v908_v19, %v2305_v38 }
 0x408   :  { %v938_v33 = vsel %vm231_vm14, %v930_v24, %v937_v18  ;;  %v860_v35 = vperm.slane %v854_v30, %v2305_v38  ;;  %v866_v36 = vsel %vm231_vm14, %v865_v23, %v846_v62  ;;  %v919_v34 = vrot.slane %v906_v26, 4 }
 0x409   :  { %v884_v31 = vsel %vm231_vm14, %v876_v27, %v883_v29  ;;  %v1237_v42 = vpack.c.bf16 %v938_v33, %v938_v33  ;;  %v872_v43 = vperm.slane %v866_v36, %v2305_v38  ;;  %v881_v45 = vrot.slane %v876_v27, 4 }
 0x40a   :  { %v1233_v46 = vpack.c.bf16 %v884_v31, %v884_v31  ;;  %v879_v47 = vrot.slane %v860_v35, 4  ;;  %v920_v39 = vsel %vm231_vm14, %v919_v34, %v900_v48  ;;  %v933_v40 = vrot.slane %v914_v32, 4 }
 0x40b   :  { %v1376_v49 = vsel %vm1241_vm3, %v1237_v42, 0  ;;  %v882_v50 = vsel %vm231_vm14, %v881_v45, %v864_v14  ;;  %v926_v51 = vperm.slane %v920_v39, %v2305_v38  ;;  %v935_v52 = vrot.slane %v930_v24, 4 }
 0x40c   :  { %v1300_v53 = vsel %vm1241_vm3, %v1233_v46, 0  ;;  %v880_v54 = vsel %vm231_vm14, %v872_v43, %v879_v47  ;;  %v1232_v41 = vpack.c.bf16 %v882_v50, %v882_v50  ;;  %v877_v26 = vrot.slane %v872_v43, 4 }
 0x40d   :  { %1309 = vmatpush.bf16.msrb.mxu0 %v1300_v53  ;;  %v1231_v44 = vpack.c.bf16 %v880_v54, %v880_v54  ;;  %v934_v3 = vsel %vm231_vm14, %v926_v51, %v933_v40  ;;  %v936_v48 = vsel %vm231_vm14, %v935_v52, %v918_v6  ;;  %v931_v21 = vrot.slane %v926_v51, 4 }
 0x40e   :  { %v1281_v56 = vsel %vm1241_vm3, %v1232_v41, 0  ;;  %v1235_v57 = vpack.c.bf16 %v934_v3, %v934_v3  ;;  %v1236_v20 = vpack.c.bf16 %v936_v48, %v936_v48  ;;  %v878_v59 = vsel %vm231_vm14, %v877_v26, %v860_v35 }
 0x40f   :  { %v1262_v58 = vsel %vm1241_vm3, %v1231_v44, 0  ;;  %1290 = vmatpush.bf16.msra.mxu3 %v1281_v56  ;;  %v1230_v37 = vpack.c.bf16 %v878_v59, %v878_v59  ;;  %v932_v61 = vsel %vm231_vm14, %v931_v21, %v914_v32 }
 0x410   :  { %1271 = vmatpush.bf16.msra.mxu2 %v1262_v58  ;;  %v1338_v62 = vsel %vm1241_vm3, %v1235_v57, 0  ;;  %v1357_v63 = vsel %vm1241_vm3, %v1236_v20, 0  ;;  %v1234_v0 = vpack.c.bf16 %v932_v61, %v932_v61 }
 0x411   :  { %1385 = vmatpush.bf16.msra.mxu0 %v1376_v49  ;;  %v1243_v1 = vsel %vm1241_vm3, %v1230_v37, 0 }
 0x412   :  { %1252 = vmatpush.bf16.msra.mxu1 %v1243_v1  ;;  %v1319_v2 = vsel %vm1241_vm3, %v1234_v0, 0  ;;  %vm1835_vm3 = vcmask 523264  }
 0x413   :  { %1366 = vmatpush.bf16.msrb.mxu3 %v1357_v63 }
 0x414   :  { %1347 = vmatpush.bf16.msrb.mxu2 %v1338_v62 }
 0x416   :  { %1328 = vmatpush.bf16.msrb.mxu1 %v1319_v2 }
 0x440   :  { %v1184_v4 = vpop.xlane.xlu0 %1183 }
 0x441   :  { %2057 = vrcp.f32 %v1184_v4 }
 0x444   :  { %v1190_v5 = vpop.xlane.xlu1 %1189 }
 0x445   :  { %2059 = vrcp.f32 %v1190_v5 }
 0x447   :  { %v2058_v8 = vpop.eup %2057  ;;  %v1187_v9 = vpop.xlane.xlu2 %1186 }
 0x448   :  { %v1214_v6 = vmul.f32 %v2058_v8, %v2577_v22  ;;  %2061 = vrcp.f32 %v1187_v9 }
 0x44a   :  { %v1222_v14 = vpack.c.bf16 %v1214_v6, %v1214_v6 }
 0x44b   :  { %v2060_v15 = vpop.eup %2059 }
 0x44c   :  { %v1216_v16 = vmul.f32 %v2060_v15, %v2581_v55  ;;  %1894 = vmatmul.msk.bf16.vlgmr.msra.gmra.mxu1 %vm955_vm15, %v1222_v14  ;;  %v1193_v19 = vpop.xlane.xlu1 %1192 }
 0x44d   :  { %2063 = vrcp.f32 %v1193_v19 }
 0x44e   :  { %v2062_v13 = vpop.eup %2061  ;;  %v1224_v24 = vpack.c.bf16 %v1216_v16, %v1216_v16 }
 0x44f   :  { %v1215_v18 = vmul.f32 %v2062_v13, %v2585_v25 }
 0x450   :  { %1896 = vmatmul.msk.bf16.vlgmr.msra.gmra.mxu3 %vm955_vm15, %v1224_v24 }
 0x451   :  { %v1223_v23 = vpack.c.bf16 %v1215_v18, %v1215_v18 }
 0x453   :  { %v2064_v27 = vpop.eup %2063  ;;  %1895 = vmatmul.msk.bf16.vlgmr.msra.gmra.mxu2 %vm955_vm15, %v1223_v23 }
 0x454   :  { %v1217_v22 = vmul.f32 %v2064_v27, %v2589_v60  ;;  %v1196_v29 = vpop.xlane.xlu1 %1195 }
 0x455   :  { %2065 = vrcp.f32 %v1196_v29 }
 0x456   :  { %v1225_v30 = vpack.c.bf16 %v1217_v22, %v1217_v22 }
 0x457   :  { %v1202_v55 = vpop.xlane.xlu2 %1201 }
 0x458   :  { %2067 = vrcp.f32 %v1202_v55  ;;  %v1199_v32 = vpop.xlane.xlu0 %1198  ;;  %1897 = vmatmul.msk.bf16.vlgmr.msrb.gmra.mxu0 %vm955_vm15, %v1225_v30 }
 0x459   :  { %2069 = vrcp.f32 %v1199_v32 }
 0x45b   :  { %v2066_v33 = vpop.eup %2065 }
 0x45c   :  { %v1218_v25 = vmul.f32 %v2066_v33, %v2594_v7 }
 0x45e   :  { %v2068_v35 = vpop.eup %2067  ;;  %v1226_v36 = vpack.c.bf16 %v1218_v25, %v1218_v25 }
 0x45f   :  { %v2070_v34 = vpop.eup %2069  ;;  %v1220_v31 = vmul.f32 %v2068_v35, %v2598_v11  ;;  %v1205_v42 = vpop.xlane.xlu2 %1204 }
 0x460   :  { %v1219_v60 = vmul.f32 %v2070_v34, %v2600_v12  ;;  %2071 = vrcp.f32 %v1205_v42  ;;  %1898 = vmatmul.msk.bf16.vlgmr.msrb.gmra.mxu1 %vm955_vm15, %v1226_v36 }
 0x461   :  { %v1228_v43 = vpack.c.bf16 %v1220_v31, %v1220_v31 }
 0x462   :  { %v1227_v45 = vpack.c.bf16 %v1219_v60, %v1219_v60 }
 0x463   :  { %1900 = vmatmul.msk.bf16.vlgmr.msrb.gmra.mxu3 %vm955_vm15, %v1228_v43 }
 0x464   :  { %1899 = vmatmul.msk.bf16.vlgmr.msrb.gmra.mxu2 %vm955_vm15, %v1227_v45 }
 0x466   :  { %v2072_v46 = vpop.eup %2071 }
 0x467   :  { %v1221_v7 = vmul.f32 %v2072_v46, %v2606_v17 }
 0x469   :  { %v1229_v47 = vpack.c.bf16 %v1221_v7, %v1221_v7 }
 0x46b   :  { %1901 = vmatmul.msk.bf16.vlgmr.msra.gmra.mxu0 %vm955_vm15, %v1229_v47 }
 0x4c9   :  { %v1254_v39 = vpop.f32.mrf.mxu1 }
 0x4ca   :  { %v1393_v40 = vrot.slane %v1254_v39, 4 }
 0x4d1   :  { %v1256_v11 = vpop.f32.mrf.mxu1 }
 0x4d3   :  { %v1292_v49 = vpop.f32.mrf.mxu3 }
 0x4d4   :  { %v1391_v12 = vrot.slane %v1292_v49, 4  ;;  %v1394_v50 = vsel %vm231_vm14, %v1292_v49, %v1393_v40 }
 0x4d5   :  { %v1402_v51 = vperm.slane %v1394_v50, %v2297_v28  ;;  %v1311_v52 = vpop.f32.mrf.mxu0 }
 0x4d6   :  { %v1273_v53 = vpop.f32.mrf.mxu2  ;;  %v1392_v54 = vsel %vm231_vm14, %v1391_v12, %v1254_v39  ;;  %v1403_v41 = vrot.slane %v1311_v52, 4 }
 0x4d7   :  { %v1405_v26 = vrot.slane %v1273_v53, 4  ;;  %v1398_v17 = vperm.slane %v1392_v54, %v2297_v28  ;;  %v1429_v44 = vrot.slane %v1402_v51, 4 }
 0x4d8   :  { %v1404_v3 = vsel %vm231_vm14, %v1403_v41, %v1273_v53 }
 0x4d9   :  { %v1417_v48 = vrot.slane %v1398_v17, 4  ;;  %v1406_v21 = vsel %vm231_vm14, %v1311_v52, %v1405_v26  ;;  %v1410_v56 = vperm.slane %v1404_v3, %v2297_v28 }
 0x4da   :  { %v1414_v57 = vperm.slane %v1406_v21, %v2297_v28 }
 0x4db   :  { %v1415_v20 = vrot.slane %v1410_v56, 4  ;;  %v1418_v59 = vsel %vm231_vm14, %v1410_v56, %v1417_v48  ;;  %v1294_v58 = vpop.f32.mrf.mxu3 }
 0x4dc   :  { %v1426_v37 = vperm.slane %v1418_v59, %v2305_v38  ;;  %v1427_v61 = vrot.slane %v1414_v57, 4  ;;  %v1430_v62 = vsel %vm231_vm14, %v1414_v57, %v1429_v44 }
 0x4dd   :  { %v1416_v63 = vsel %vm231_vm14, %v1415_v20, %v1398_v17  ;;  %v1438_v0 = vperm.slane %v1430_v62, %v2305_v38  ;;  %v1313_v1 = vpop.f32.mrf.mxu0  ;;  %v1330_v2 = vpop.f32.mrf.mxu1 }
 0x4de   :  { %v1422_v4 = vperm.slane %v1416_v63, %v2305_v38  ;;  %v1428_v5 = vsel %vm231_vm14, %v1427_v61, %v1402_v51  ;;  %v1441_v8 = vrot.slane %v1426_v37, 4  ;;  %v1275_v9 = vpop.f32.mrf.mxu2  ;;  %v1449_v35 = vrot.slane %v1330_v2, 4 }
 0x4df   :  { %v1434_v6 = vperm.slane %v1428_v5, %v2305_v38  ;;  %v1445_v14 = vrot.slane %v1438_v0, 4 }
 0x4e0   :  { %v1439_v15 = vrot.slane %v1422_v4, 4  ;;  %v1442_v16 = vsel %vm231_vm14, 0.0, %v1441_v8  ;;  %v1503_v19 = vsel %vm231_vm14, %v1441_v8, %v1422_v4 }
 0x4e1   :  { %v1443_v13 = vrot.slane %v1434_v6, 4  ;;  %v1446_v24 = vsel %vm231_vm14, 0.0, %v1445_v14  ;;  %v1508_v18 = vrot.slane %v1442_v16, 4  ;;  %v1514_v23 = vsel %vm231_vm14, %v1445_v14, %v1434_v6 }
 0x4e2   :  { %v1519_v27 = vrot.slane %v1446_v24, 4  ;;  %v1440_v22 = vsel %vm231_vm14, 0.0, %v1439_v15  ;;  %v1518_v55 = vperm.slane %v1514_v23, %v2297_v28  ;;  %v1507_v33 = vperm.slane %v1503_v19, %v2297_v28 }
 0x4e3   :  { %v1444_v29 = vsel %vm231_vm14, 0.0, %v1443_v13  ;;  %v1509_v30 = vsel %vm231_vm14, %v1508_v18, %v1440_v22 }
 0x4e4   :  { %v1520_v32 = vsel %vm231_vm14, %v1519_v27, %v1444_v29  ;;  %v1513_v25 = vperm.slane %v1509_v30, %v2297_v28  ;;  %v1539_v46 = vrot.slane %v1518_v55, 4  ;;  %v1527_v11 = vrot.slane %v1507_v33, 4 }
 0x4e5   :  { %v1332_v36 = vpop.f32.mrf.mxu1  ;;  %v1524_v42 = vperm.slane %v1520_v32, %v2297_v28 }
 0x4e6   :  { %v1368_v34 = vpop.f32.mrf.mxu3  ;;  %v1525_v31 = vrot.slane %v1513_v25, 4  ;;  %v1528_v44 = vsel %vm231_vm14, %v1513_v25, %v1527_v11 }
 0x4e7   :  { %v1349_v60 = vpop.f32.mrf.mxu2  ;;  %v1447_v43 = vrot.slane %v1368_v34, 4  ;;  %v1450_v45 = vsel %vm231_vm14, %v1368_v34, %v1449_v35  ;;  %v1537_v41 = vrot.slane %v1524_v42, 4  ;;  %v1540_v3 = vsel %vm231_vm14, %v1524_v42, %v1539_v46 }
 0x4e8   :  { %v1461_v7 = vrot.slane %v1349_v60, 4  ;;  %v1458_v47 = vperm.slane %v1450_v45, %v2297_v28  ;;  %v1387_v39 = vpop.f32.mrf.mxu0  ;;  %v1526_v52 = vsel %vm231_vm14, %v1525_v31, %v1507_v33  ;;  %v1536_v14 = vperm.slane %v1528_v44, %v2305_v38 }
 0x4e9   :  { %v1448_v40 = vsel %vm231_vm14, %v1447_v43, %v1330_v2  ;;  %v1459_v49 = vrot.slane %v1387_v39, 4  ;;  %v2755_v56 = vperm.slane %v1526_v52, %v2305_v38  ;;  %v1538_v57 = vsel %vm231_vm14, %v1537_v41, %v1518_v55 }
 0x4ea   :  { %v1454_v12 = vperm.slane %v1448_v40, %v2297_v28  ;;  %v1485_v50 = vrot.slane %v1458_v47, 4  ;;  %v1462_v51 = vsel %vm231_vm14, %v1387_v39, %v1461_v7  ;;  %v1544_v61 = vperm.slane %v1538_v57, %v2305_v38 }
 0x4eb   :  { %v1460_v53 = vsel %vm231_vm14, %v1459_v49, %v1349_v60  ;;  %v1470_v54 = vperm.slane %v1462_v51, %v2297_v28  ;;  %v1548_v15 = vperm.slane %v1540_v3, %v2305_v38  ;;  %v1555_v43 = vrot.slane %v1536_v14, 4 }
 0x4ec   :  { %v1473_v26 = vrot.slane %v1454_v12, 4  ;;  %v1466_v17 = vperm.slane %v1460_v53, %v2297_v28  ;;  %v1549_v8 = vrot.slane %v1544_v61, 4  ;;  %v1551_v40 = vrot.slane %v2755_v56, 4 }
 0x4ed   :  { %v1483_v48 = vrot.slane %v1470_v54, 4  ;;  %v1486_v21 = vsel %vm231_vm14, %v1470_v54, %v1485_v50  ;;  %v1553_v60 = vrot.slane %v1548_v15, 4  ;;  %v1556_v54 = vsel %vm231_vm14, %v1548_v15, %v1555_v43 }
 0x4ee   :  { %v1471_v20 = vrot.slane %v1466_v17, 4  ;;  %v1474_v59 = vsel %vm231_vm14, %v1466_v17, %v1473_v26  ;;  %v1494_v58 = vperm.slane %v1486_v21, %v2305_v38  ;;  %v1370_v37 = vpop.f32.mrf.mxu3  ;;  %v2772_v24 = vsel %vm231_vm14, %v1549_v8, %v2755_v56 }
 0x4ef   :  { %v1482_v62 = vperm.slane %v1474_v59, %v2305_v38  ;;  %v1484_v63 = vsel %vm231_vm14, %v1483_v48, %v1458_v47  ;;  %v1351_v0 = vpop.f32.mrf.mxu2  ;;  %v1554_v53 = vsel %vm231_vm14, %v1553_v60, %v1536_v14  ;;  %v1552_v21 = vsel %vm231_vm14, %v1544_v61, %v1551_v40  ;;  %v1939_v59 = vld [vmem:[%s2866_s4] sm:$0xff] }
 0x4f0   :  { %v1472_v1 = vsel %vm231_vm14, %v1471_v20, %v1454_v12  ;;  %v1490_v2 = vperm.slane %v1484_v63, %v2305_v38  ;;  %v1501_v4 = vrot.slane %v1494_v58, 4  ;;  %v1389_v5 = vpop.f32.mrf.mxu0  ;;  %v1940_v20 = vld [vmem:[%s2866_s4 + $0x8] sm:$0xff] }
 0x4f1   :  { %v1478_v9 = vperm.slane %v1472_v1, %v2305_v38  ;;  %v1497_v6 = vrot.slane %v1482_v62, 4  ;;  %1670 = vmatpush.bf16.msra.mxu1 %v1940_v20 }
 0x4f2   :  { %v1499_v16 = vrot.slane %v1490_v2, 4  ;;  %v1502_v19 = vsel %vm231_vm14, 0.0, %v1501_v4  ;;  %v1568_v13 = vsel %vm231_vm14, %v1501_v4, %v1490_v2 }
 0x4f3   :  { %v1495_v18 = vrot.slane %v1478_v9, 4  ;;  %v1498_v23 = vsel %vm231_vm14, 0.0, %v1497_v6  ;;  %v1557_v27 = vsel %vm231_vm14, %v1497_v6, %v1478_v9  ;;  %v1572_v22 = vperm.slane %v1568_v13, %v2297_v28 }
 0x4f4   :  { %v1500_v29 = vsel %vm231_vm14, 0.0, %v1499_v16  ;;  %v1562_v30 = vrot.slane %v1498_v23, 4  ;;  %v1573_v55 = vrot.slane %v1502_v19, 4  ;;  %v1561_v32 = vperm.slane %v1557_v27, %v2297_v28  ;;  %v2026_v19 = vld [vmem:[#allocation5 + $0x4] ss:$0 sm:$0xff]  ;;  %v2081_v23 = vld [vmem:[%s2862_s0] sm:$0xff] }
 0x4f5   :  { %v1593_v33 = vrot.slane %v1572_v22, 4  ;;  %v1496_v25 = vsel %vm231_vm14, 0.0, %v1495_v18  ;;  %1671 = vmatpush.bf16.msra.mxu1 %v1939_v59 }
 0x4f6   :  { %v1574_v35 = vsel %vm231_vm14, %v1573_v55, %v1500_v29  ;;  %v1563_v36 = vsel %vm231_vm14, %v1562_v30, %v1496_v25  ;;  %v1581_v34 = vrot.slane %v1561_v32, 4  ;;  %v2082_v30 = vld [vmem:[%s2862_s0 + $0x8] sm:$0xff] }
 0x4f7   :  { %v1578_v31 = vperm.slane %v1574_v35, %v2297_v28  ;;  %v1567_v42 = vperm.slane %v1563_v36, %v2297_v28 }
 0x4f9   :  { %v1582_v45 = vsel %vm231_vm14, %v1567_v42, %v1581_v34  ;;  %v1594_v46 = vsel %vm231_vm14, %v1578_v31, %v1593_v33  ;;  %v1579_v7 = vrot.slane %v1567_v42, 4  ;;  %v1591_v47 = vrot.slane %v1578_v31, 4 }
 0x4fa   :  { %v1590_v39 = vperm.slane %v1582_v45, %v2305_v38  ;;  %v1602_v11 = vperm.slane %v1594_v46, %v2305_v38 }
 0x4fb   :  { %v1580_v49 = vsel %vm231_vm14, %v1579_v7, %v1561_v32  ;;  %v1592_v12 = vsel %vm231_vm14, %v1591_v47, %v1572_v22  ;;  %v1942_v47 = vld [vmem:[#allocation7 + $0x8] sm:$0xff] }
 0x4fc   :  { %v1607_v50 = vrot.slane %v1602_v11, 4  ;;  %v1609_v28 = vrot.slane %v1590_v39, 4  ;;  %v1586_v51 = vperm.slane %v1580_v49, %v2305_v38  ;;  %v1598_v52 = vperm.slane %v1592_v12, %v2305_v38  ;;  %1791 = vmatpush.bf16.msra.mxu2 %v1942_v47 }
 0x4fe   :  { %v1608_v41 = vsel %vm231_vm14, %v1607_v50, %v1590_v39  ;;  %v1610_v26 = vsel %vm231_vm14, %v1602_v11, %v1609_v28  ;;  %v1603_v17 = vrot.slane %v1598_v52, 4  ;;  %v1605_v44 = vrot.slane %v1586_v51, 4  ;;  %v1941_v39 = vld [vmem:[#allocation7] sm:$0xff] }
 0x4ff   :  { %v2013_v3 = vpack.i.bf16 %v1608_v41, %v1554_v53  ;;  %v2018_v48 = vpack.i.bf16 %v1610_v26, %v1556_v54 }
 0x500   :  { %v1606_v56 = vsel %vm231_vm14, %v1598_v52, %v1605_v44  ;;  %v1604_v57 = vsel %vm231_vm14, %v1603_v17, %v1586_v51  ;;  %1792 = vmatpush.bf16.msra.mxu2 %v1941_v39 }
 0x501   :  { %2014 = vrot.lane.b32.xlu1 %v2013_v3, %s2197_s26  ;;  %2019 = vrot.lane.b32.xlu2 %v2018_v48, %s2198_s27  ;;  %v2008_v38 = vpack.i.bf16 %v1606_v56, %v1552_v21 }
 0x503   :  { %2009 = vrot.lane.b32.xlu0 %v2008_v38, %s2199_s28 }
 0x55b   :  { %v2020_v37 = vpop.permute.xlu2 %2019 }
 0x55c   :  { %v2022_v2 = vunpack.i.h.bf16 %v2020_v37  ;;  %v2021_v4 = vunpack.i.l.bf16 %v2020_v37 }
 0x573   :  { %v2015_v58 = vpop.permute.xlu1 %2014 }
 0x574   :  { %v2017_v0 = vunpack.i.h.bf16 %v2015_v58  ;;  %v2016_v1 = vunpack.i.l.bf16 %v2015_v58 }
 0x575   :  { %v2010_v61 = vpop.permute.xlu0 %2009 }
 0x576   :  { %v2012_v62 = vunpack.i.h.bf16 %v2010_v61  ;;  %v2011_v63 = vunpack.i.l.bf16 %v2010_v61 }
 0x578   :  { %v1635_v5 = vsel %vm955_vm15, %v2772_v24, %v2011_v63  ;;  %v1636_v8 = vsel %vm955_vm15, %v1604_v57, %v2012_v62 }
 0x579   :  { %v1638_v9 = vsel %vm1637_vm4, %v1635_v5, %v2016_v1  ;;  %v1639_v6 = vsel %vm1637_vm4, %v1636_v8, %v2017_v0 }
 0x57a   :  { %v1641_v14 = vsel %vm1640_vm5, %v1638_v9, %v2021_v4  ;;  %v1642_v15 = vsel %vm1640_vm5, %v1639_v6, %v2022_v2 }
 0x57b   :  { %v1643_v16 = vpack.c.bf16 %v1642_v15, %v1641_v14 }
 0x57d   :  { %1910 = vmatmul.msk.bf16.vlgmr.msra.gmra.mxu1 %vm83_vm0, %v1643_v16 }
 0x5fa   :  { %v1673_v13 = vpop.f32.mrf.mxu1 }
 0x5fb   :  { %v1674_v18 = vadd.f32 %v2026_v19, %v1673_v13 }
 0x5fd   :  { %v2814_v27 = vadd.f32 %v2081_v23, %v1674_v18  ;;  %v2027_v23 = vld [vmem:[#allocation5 + $0x2] ss:$0 sm:$0xff] }
 0x5ff   :  { %v1680_v24 = vsel %vm83_vm0, %v2814_v27, 0.0 }
 0x600   :  { %1681 = vadd.xlane.f32.xlu0 %v1680_v24 }
 0x602   :  { %v1675_v22 = vpop.f32.mrf.mxu1 }
 0x603   :  { %v1676_v29 = vadd.f32 %v2026_v19, %v1675_v22 }
 0x605   :  { %v2821_v55 = vadd.f32 %v2082_v30, %v1676_v29 }
 0x607   :  { %v1683_v32 = vsel %vm83_vm0, %v2821_v55, 0.0 }
 0x608   :  { %1684 = vadd.xlane.f32.xlu1 %v1683_v32 }
 0x673   :  { %v1682_v33 = vpop.xlane.xlu0 %1681 }
 0x674   :  { %v1686_v25 = vmul.f32 %v1682_v33, %v2263_v10  ;;  %v2028_v33 = vld [vmem:[#allocation5 + $0x3] ss:$0 sm:$0xff] }
 0x676   :  { %v2827_v35 = vsub.f32 %v2814_v27, %v1686_v25 }
 0x678   :  { %v1690_v36 = vmul.f32 %v2827_v35, %v2827_v35 }
 0x67a   :  { %v1692_v34 = vsel %vm83_vm0, %v1690_v36, 0.0 }
 0x67b   :  { %v1685_v31 = vpop.xlane.xlu1 %1684  ;;  %1693 = vadd.xlane.f32.xlu2 %v1692_v34 }
 0x67c   :  { %v1687_v42 = vmul.f32 %v1685_v31, %v2263_v10 }
 0x67e   :  { %v2834_v60 = vsub.f32 %v2821_v55, %v1687_v42  ;;  %v1945_v42 = vld [vmem:[%s2868_s6 + $0x10] sm:$0xff] }
 0x680   :  { %v1691_v43 = vmul.f32 %v2834_v60, %v2834_v60 }
 0x682   :  { %v1695_v45 = vsel %vm83_vm0, %v1691_v43, 0.0  ;;  %v1943_v43 = vld [vmem:[%s2868_s6] sm:$0xff] }
 0x683   :  { %1696 = vadd.xlane.f32.xlu0 %v1695_v45 }
 0x6ee   :  { %v1694_v46 = vpop.xlane.xlu2 %1693 }
 0x6ef   :  { %v1698_v7 = vmul.f32 0.032258064, %v1694_v46  ;;  %v2029_v46 = vld [vmem:[#allocation5 + $0x7] ss:$0 sm:$0xff] }
 0x6f1   :  { %2073 = vrsqrt.f32 %v1698_v7  ;;  %vm1707_vm6 = vcmp.eq.f32.partialorder %v1698_v7, inf  ;;  %v1710_v26 = vand.u32 2147483648, %v1698_v7  ;;  %vm1709_vm7 = vcmp.eq.f32.partialorder %v1698_v7, 0.0 }
 0x6f6   :  { %v1697_v11 = vpop.xlane.xlu0 %1696 }
 0x6f7   :  { %v2074_v40 = vpop.eup %2073  ;;  %v1699_v49 = vmul.f32 0.032258064, %v1697_v11 }
 0x6f8   :  { %v1701_v10 = vmul.f32 %v2074_v40, %v1698_v7 }
 0x6f9   :  { %2075 = vrsqrt.f32 %v1699_v49  ;;  %vm1719_vm8 = vcmp.eq.f32.partialorder %v1699_v49, inf  ;;  %v1722_v38 = vand.u32 2147483648, %v1699_v49  ;;  %vm1721_vm9 = vcmp.eq.f32.partialorder %v1699_v49, 0.0 }
 0x6fa   :  { %v1702_v12 = vmul.f32 %v2074_v40, %v1701_v10  ;;  %v2030_v10 = vld [vmem:[#allocation5 + $0x5] ss:$0 sm:$0xff] }
 0x6fc   :  { %v1703_v50 = vmul.f32 0.5, %v1702_v12 }
 0x6fe   :  { %v1704_v28 = vsub.f32 1.5, %v1703_v50 }
 0x6ff   :  { %v2076_v51 = vpop.eup %2075 }
 0x700   :  { %v1705_v52 = vmul.f32 %v2074_v40, %v1704_v28  ;;  %v1713_v53 = vmul.f32 %v2076_v51, %v1699_v49 }
 0x702   :  { %v1706_v54 = vmul.f32 %v1705_v52, %v1698_v7  ;;  %v1714_v41 = vmul.f32 %v2076_v51, %v1713_v53 }
 0x704   :  { %v1708_v17 = vsel %vm1707_vm6, %v1698_v7, %v1706_v54  ;;  %v1715_v44 = vmul.f32 0.5, %v1714_v41 }
 0x705   :  { %v1711_v3 = vsel %vm1709_vm7, %v1710_v26, %v1708_v17 }
 0x706   :  { %v1724_v48 = vadd.f32 1e-06, %v1711_v3  ;;  %v1716_v21 = vsub.f32 1.5, %v1715_v44 }
 0x708   :  { %2077 = vrcp.f32 %v1724_v48  ;;  %v1717_v56 = vmul.f32 %v2076_v51, %v1716_v21  ;;  %v1737_v0 = vand.u32 2147483648, %v1724_v48  ;;  %vm1731_vm11 = vweird.f32 %v1724_v48 }
 0x709   :  { %v1735_v2 = vand.u32 2147483647, %v1724_v48 }
 0x70a   :  { %v1718_v57 = vmul.f32 %v1717_v56, %v1699_v49  ;;  %v1738_v9 = vor.u32 1.1754944e-38, %v1737_v0 }
 0x70b   :  { %vm1736_vm13 = vcmp.eq.f32.partialorder %v1735_v2, 8.507059e+37 }
 0x70c   :  { %v1720_v20 = vsel %vm1719_vm8, %v1699_v49, %v1718_v57 }
 0x70d   :  { %v1723_v59 = vsel %vm1721_vm9, %v1722_v38, %v1720_v20 }
 0x70e   :  { %v2078_v58 = vpop.eup %2077  ;;  %v1725_v37 = vadd.f32 1e-06, %v1723_v59 }
 0x70f   :  { %v1727_v61 = vmul.f32 %v2078_v58, %v1724_v48  ;;  %vm1732_vm10 = vweird.f32 %v2078_v58 }
 0x710   :  { %2079 = vrcp.f32 %v1725_v37  ;;  %vm1733_vm12 = vmor %vm1731_vm11, %vm1732_vm10  ;;  %v1752_v15 = vand.u32 2147483648, %v1725_v37  ;;  %v1750_v19 = vand.u32 2147483647, %v1725_v37  ;;  %vm1746_vm15 = vweird.f32 %v1725_v37 }
 0x711   :  { %v1728_v62 = vsub.f32 1.0, %v1727_v61 }
 0x712   :  { %v1753_v24 = vor.u32 1.1754944e-38, %v1752_v15  ;;  %vm1751_vm2 = vcmp.eq.f32.partialorder %v1750_v19, 8.507059e+37 }
 0x713   :  { %v1729_v63 = vmul.f32 %v2078_v58, %v1728_v62 }
 0x715   :  { %v1730_v1 = vadd.f32 %v2078_v58, %v1729_v63 }
 0x716   :  { %v2080_v4 = vpop.eup %2079 }
 0x717   :  { %v1734_v5 = vsel %vm1733_vm12, %v2078_v58, %v1730_v1  ;;  %v1742_v8 = vmul.f32 %v2080_v4, %v1725_v37  ;;  %vm1747_vm14 = vweird.f32 %v2080_v4 }
 0x718   :  { %v1739_v14 = vsel %vm1736_vm13, %v1738_v9, %v1734_v5  ;;  %vm1748_vm1 = vmor %vm1746_vm15, %vm1747_vm14 }
 0x719   :  { %v1743_v6 = vsub.f32 1.0, %v1742_v8  ;;  %v1756_v18 = vmul.f32 %v1739_v14, %v2827_v35  ;;  %v1946_v35 = vld [vmem:[%s2868_s6 + $0x18] sm:$0xff] }
 0x71a   :  { %1843 = vmatpush.bf16.msra.mxu3 %v1946_v35 }
 0x71b   :  { %v1744_v16 = vmul.f32 %v2080_v4, %v1743_v6  ;;  %v1759_v32 = vmul.f32 %v2027_v23, %v1756_v18 }
 0x71d   :  { %v1745_v13 = vadd.f32 %v2080_v4, %v1744_v16  ;;  %v1762_v36 = vadd.f32 %v2028_v33, %v1759_v32 }
 0x71e   :  { %1844 = vmatpush.bf16.msra.mxu3 %v1945_v42 }
 0x71f   :  { %v1749_v22 = vsel %vm1748_vm1, %v2080_v4, %v1745_v13 }
 0x720   :  { %v1754_v29 = vsel %vm1751_vm2, %v1753_v24, %v1749_v22 }
 0x721   :  { %v1757_v30 = vmul.f32 %v1754_v29, %v2834_v60  ;;  %v1944_v60 = vld [vmem:[%s2868_s6 + $0x8] sm:$0xff] }
 0x722   :  { %1845 = vmatpush.bf16.msra.mxu3 %v1944_v60 }
 0x723   :  { %v1760_v25 = vmul.f32 %v2027_v23, %v1757_v30 }
 0x725   :  { %v1763_v34 = vadd.f32 %v2028_v33, %v1760_v25 }
 0x726   :  { %1846 = vmatpush.bf16.msra.mxu3 %v1943_v43 }
 0x727   :  { %v1764_v31 = vpack.c.bf16 %v1763_v34, %v1762_v36 }
 0x729   :  { %1919 = vmatmul.msk.bf16.vlgmr.msra.gmra.mxu2 %vm83_vm0, %v1764_v31 }
 0x7ac   :  { %v1794_v45 = vpop.f32.mrf.mxu2 }
 0x7ad   :  { %v1795_v7 = vadd.f32 %v2029_v46, %v1794_v45 }
 0x7af   :  { %v1799_v11 = vmax.f32 %v1795_v7, 0.0 }
 0x7b4   :  { %v1796_v47 = vpop.f32.mrf.mxu2 }
 0x7b5   :  { %v1797_v39 = vadd.f32 %v2029_v46, %v1796_v47 }
 0x7b7   :  { %v1800_v40 = vmax.f32 %v1797_v39, 0.0 }
 0x7b9   :  { %v1801_v49 = vpack.c.bf16 %v1800_v40, %v1799_v11 }
 0x7bb   :  { %1936 = vmatmul.msk.bf16.vlgmr.msra.gmra.mxu3 %vm1835_vm3, %v1801_v49 }
 0x83e   :  { %v1848_v12 = vpop.f32.mrf.mxu3 }
 0x83f   :  { %v1849_v50 = vadd.f32 %v2030_v10, %v1848_v12 }
 0x841   :  { %v1853_v28 = vadd.f32 %v1849_v50, %v2814_v27 }
 0x843   :  { %1855 = vst.msk [vmem:[#allocation8] sm:$0xff] %vm83_vm0, %v1853_v28 }
 0x846   :  { %v1850_v51 = vpop.f32.mrf.mxu3 }
 0x847   :  { %v1851_v52 = vadd.f32 %v2030_v10, %v1850_v51 }
 0x849   :  { %v1854_v53 = vadd.f32 %v1851_v52, %v2821_v55 }
 0x84b   :  { %1856 = vst.msk [vmem:[#allocation8 + $0x8] sm:$0xff] %vm83_vm0, %v1854_v53 }
 0x84c   :  { %1869 = dma.vmem_to_hbm [thread:$0]  %s1862_s20, 256, %s1864_s18, [#allocation4], %s2201_s21, %s2201_s21, %s2199_s28  }
 0x84d   :  { %2183 = dma.done.wait [#allocation4], 256  }
 0x84e   :  { %2184 = vsyncadd [#allocation4], 4294967040 }
 0x84f   :  { %1874 = vsyncpa [#allocation3], 1 }
 0x850   :  { %1875 = vsyncpa [#allocation6], 1 }
 0x851   :  { %1876 = vsyncpa [#allocation4], 1 }

</bundles_post_ra>
